<compile_context>
chip_gen: v5e
topology: v5e:2x2
jax: 0.10.0
libtpu: 0.0.40
codegen_flags: <defaults>
</compile_context>

<pallas_src>
import functools
import math

import jax
import jax.numpy as jnp
from jax import lax
from jax.experimental import pallas as pl
from jax.experimental.pallas import tpu as pltpu

GROUPS, GC = 4, 8
WIDTH = GROUPS * GC          # 32  bottleneck width
CSTEM = 16                   # stem / bottleneck output channels
KSTEM = 32                   # stem im2col K, zero-padded 27 -> 32
KH = KW = 3


# ----------------------------------------------------------------------------
# Fused Pallas kernel: whole forward for one image per grid step.
# ----------------------------------------------------------------------------
def _fused_kernel(targets_ref,                         # SMEM (N,)  scalar prefetch
                  patches_ref,                         # (1, HW, KSTEM)
                  stem_w_ref, stem_b_ref,
                  c1_w_ref, c1_b_ref,
                  c2_w_ref, c2_b_ref,
                  c3_w_ref, c3_b_ref,
                  fc_wT_ref, fc_w_ref, fc_b_ref,
                  logits_ref, cam_ref,                 # (1,1,NC), (1,1,HW)
                  pad_ref,                             # VMEM (Ho+2, Wo+2, WIDTH)
                  *, ho, wo, nc, use_labels):
    hw = ho * wo
    inv_hw = 1.0 / float(hw)

    # ---- stem conv3x3/2 (pre-im2col'd, K padded to 32) + bias + ReLU -------
    p = patches_ref[0]                                                # (HW, 32)
    h = jnp.dot(p, stem_w_ref[...], preferred_element_type=jnp.float32)
    h = jnp.maximum(h + stem_b_ref[...], 0.0)                         # (HW, 16)

    # ---- bottleneck c1 1x1 + ReLU ------------------------------------------
    h1 = jnp.dot(h, c1_w_ref[...], preferred_element_type=jnp.float32)
    h1 = jnp.maximum(h1 + c1_b_ref[...], 0.0)                         # (HW, 32)

    # ---- grouped 3x3: taps sliced from a zero-padded VMEM tile -------------
    pad_ref[...] = jnp.zeros_like(pad_ref)
    pad_ref[1:1 + ho, 1:1 + wo, :] = h1.reshape(ho, wo, WIDTH)
    acc = jnp.zeros((hw, WIDTH), jnp.float32)
    taps = [(dy, dx) for dy in range(KH) for dx in range(KW)]
    for t, (dy, dx) in enumerate(taps):
        tap = pad_ref[dy:dy + ho, dx:dx + wo, :].reshape(hw, WIDTH)
        acc = acc + jnp.dot(tap, c2_w_ref[t],
                            preferred_element_type=jnp.float32)
    h2 = jnp.maximum(acc + c2_b_ref[...], 0.0)                        # (HW, 32)

    # ---- c3 1x1 + bias + residual + ReLU (fused epilogue) ------------------
    A = jnp.dot(h2, c3_w_ref[...], preferred_element_type=jnp.float32)
    A = jnp.maximum(A + c3_b_ref[...] + h, 0.0)                       # (HW, 16)

    # ---- head: GAP + FC ------------------------------------------------------
    feats = jnp.sum(A, axis=0, keepdims=True) * inv_hw                # (1, 16)
    logits = jnp.dot(feats, fc_wT_ref[...],
                     preferred_element_type=jnp.float32) + fc_b_ref[...]
    logits_ref[0] = logits                                            # (1, NC)

    # ---- GradCAM (analytic grads of GAP+Linear head) ------------------------
    idx = lax.broadcasted_iota(jnp.int32, (1, nc), 1)
    if use_labels:
        tgt = targets_ref[pl.program_id(0)]
        onehot = (idx == tgt).astype(jnp.float32)
    else:
        # in-kernel argmax via max / iota / min (first max index)
        maxv = jnp.max(logits, axis=-1, keepdims=True)
        first = jnp.min(jnp.where(logits >= maxv, idx, nc),
                        axis=-1, keepdims=True)
        onehot = (idx == first).astype(jnp.float32)
    alpha = jnp.dot(onehot, fc_w_ref[...],
                    preferred_element_type=jnp.float32) * inv_hw      # (1, 16)
    cam = lax.dot_general(alpha, A, (((1,), (1,)), ((), ())),
                          preferred_element_type=jnp.float32)         # (1, HW)
    cam_ref[0] = jnp.maximum(cam, 0.0)


def pallas_resnet_gcn(patches, targets, params, *, ho, wo, nc, use_labels):
    """patches: (N, HW, KSTEM), targets: (N,) int32. One fused launch."""
    N, hw, kstem = patches.shape

    grid_spec = pltpu.PrefetchScalarGridSpec(
        num_scalar_prefetch=1,
        grid=(N,),
        in_specs=[
            pl.BlockSpec((1, hw, kstem), lambda b, t: (b, 0, 0)),      # patches
            pl.BlockSpec((kstem, CSTEM), lambda b, t: (0, 0)),         # stem_w
            pl.BlockSpec((1, CSTEM), lambda b, t: (0, 0)),             # stem_b
            pl.BlockSpec((CSTEM, WIDTH), lambda b, t: (0, 0)),         # c1_w
            pl.BlockSpec((1, WIDTH), lambda b, t: (0, 0)),             # c1_b
            pl.BlockSpec((KH * KW, WIDTH, WIDTH), lambda b, t: (0, 0, 0)),  # c2_w
            pl.BlockSpec((1, WIDTH), lambda b, t: (0, 0)),             # c2_b
            pl.BlockSpec((WIDTH, CSTEM), lambda b, t: (0, 0)),         # c3_w
            pl.BlockSpec((1, CSTEM), lambda b, t: (0, 0)),             # c3_b
            pl.BlockSpec((CSTEM, nc), lambda b, t: (0, 0)),            # fc_wT
            pl.BlockSpec((nc, CSTEM), lambda b, t: (0, 0)),            # fc_w
            pl.BlockSpec((1, nc), lambda b, t: (0, 0)),                # fc_b
        ],
        out_specs=[
            pl.BlockSpec((1, 1, nc), lambda b, t: (b, 0, 0)),          # logits
            pl.BlockSpec((1, 1, hw), lambda b, t: (b, 0, 0)),          # cam
        ],
        scratch_shapes=[pltpu.VMEM((ho + 2, wo + 2, WIDTH), jnp.float32)],
    )

    kernel = functools.partial(_fused_kernel, ho=ho, wo=wo, nc=nc,
                               use_labels=use_labels)
    logits, cam = pl.pallas_call(
        kernel,
        out_shape=(jax.ShapeDtypeStruct((N, 1, nc), jnp.float32),
                   jax.ShapeDtypeStruct((N, 1, hw), jnp.float32)),
        grid_spec=grid_spec,
        compiler_params=pltpu.CompilerParams(
            dimension_semantics=("parallel",)),
    )(targets, patches, params["stem_w"], params["stem_b"],
      params["c1_w"], params["c1_b"], params["c2_w"], params["c2_b"],
      params["c3_w"], params["c3_b"], params["fc_wT"], params["fc_w"],
      params["fc_b"])
    return logits.reshape(N, nc), cam.reshape(N, hw)


# ----------------------------------------------------------------------------
# Glue: im2col (XLA indexing only, used for the tiny 3-channel stem), params.
# ----------------------------------------------------------------------------
def im2col(x, kh, kw, stride, pad):
    """x: (N,H,W,C) NHWC -> (N,Ho,Wo,kh*kw*C) patches (dy-major, dx, then C)."""
    N, H, W, C = x.shape
    xp = jnp.pad(x, ((0, 0), (pad, pad), (pad, pad), (0, 0)))
    Ho = (H + 2 * pad - kh) // stride + 1
    Wo = (W + 2 * pad - kw) // stride + 1
    cols = []
    for dy in range(kh):
        for dx in range(kw):
            cols.append(xp[:, dy:dy + stride * Ho:stride,
                           dx:dx + stride * Wo:stride, :])
    return jnp.concatenate(cols, axis=-1)


def init_params(key, num_classes=8):
    keys = jax.random.split(key, 5)

    def conv_w(k, kh, kw, cin, cout):
        w = jax.random.normal(k, (kh, kw, cin, cout), jnp.float32)
        return (w / math.sqrt(kh * kw * cin)).reshape(kh * kw * cin, cout)

    # stem weight with K padded 27 -> 32 (zero rows; matching zero patch lanes)
    stem_w = conv_w(keys[0], KH, KW, 3, CSTEM)                      # (27, 16)
    stem_w = jnp.pad(stem_w, ((0, KSTEM - stem_w.shape[0]), (0, 0)))  # (32, 16)

    # Grouped 3x3 conv folded ONCE at init into per-tap block-diagonal
    # (9, WIDTH, WIDTH) weights -> 9 in-kernel tap matmuls, one launch.
    # TODO(synk): at ResNeXt-style group counts switch to a group grid axis
    #             with per-group (9*GC, GC) weights instead of block-diag.
    c2 = jnp.zeros((KH * KW, WIDTH, WIDTH), jnp.float32)
    for g in range(GROUPS):
        wg = conv_w(jax.random.fold_in(keys[2], g), KH, KW, GC, GC)
        wg = wg.reshape(KH * KW, GC, GC)
        c2 = c2.at[:, g * GC:(g + 1) * GC, g * GC:(g + 1) * GC].set(wg)

    fc_w = (jax.random.normal(keys[4], (num_classes, CSTEM), jnp.float32)
            / math.sqrt(CSTEM))

    return {
        "stem_w": stem_w,                                   # (32, 16)
        "stem_b": jnp.zeros((1, CSTEM), jnp.float32),
        "c1_w": conv_w(keys[1], 1, 1, CSTEM, WIDTH),        # (16, 32)
        "c1_b": jnp.zeros((1, WIDTH), jnp.float32),
        "c2_w": c2,                                         # (9, 32, 32)
        "c2_b": jnp.zeros((1, WIDTH), jnp.float32),
        "c3_w": conv_w(keys[3], 1, 1, WIDTH, CSTEM),        # (32, 16)
        "c3_b": jnp.zeros((1, CSTEM), jnp.float32),
        "fc_w": fc_w,                                       # (nc, 16)
        "fc_wT": fc_w.T,                                    # (16, nc)
        "fc_b": jnp.zeros((1, num_classes), jnp.float32),
    }


def resnet_gcn_forward(params, imgs_nchw, labels=None, return_cam=False):
    N = imgs_nchw.shape[0]
    x = jnp.transpose(imgs_nchw, (0, 2, 3, 1)).astype(jnp.float32)  # NCHW->NHWC

    patches = im2col(x, KH, KW, 2, 1)                       # (N, Ho, Wo, 27)
    _, ho, wo, kc = patches.shape
    hw = ho * wo
    patches = jnp.pad(patches, ((0, 0), (0, 0), (0, 0), (0, KSTEM - kc)))
    patches = patches.reshape(N, hw, KSTEM)

    nc = params["fc_b"].shape[-1]
    use_labels = labels is not None
    targets = (labels.astype(jnp.int32) if use_labels
               else jnp.zeros((N,), jnp.int32))

    logits, cam = pallas_resnet_gcn(patches, targets, params,
                                    ho=ho, wo=wo, nc=nc, use_labels=use_labels)
    if return_cam:
        return logits, cam.reshape(N, ho, wo)
    return logits


# ----------------------------------------------------------------------------
# Pure-JAX reference (same math, im2col formulation) for a correctness check.
# ----------------------------------------------------------------------------
def _reference_forward(params, imgs_nchw, labels=None):
    x = jnp.transpose(imgs_nchw, (0, 2, 3, 1)).astype(jnp.float32)
    patches = im2col(x, KH, KW, 2, 1)
    N, ho, wo, kc = patches.shape
    hw = ho * wo
    p = jnp.pad(patches, ((0, 0), (0, 0), (0, 0), (0, KSTEM - kc)))
    p = p.reshape(N * hw, KSTEM)
    h = jax.nn.relu(p @ params["stem_w"] + params["stem_b"])
    h1 = jax.nn.relu(h @ params["c1_w"] + params["c1_b"])
    pg = im2col(h1.reshape(N, ho, wo, WIDTH), KH, KW, 1, 1)
    pg = pg.reshape(N * hw, KH * KW, WIDTH)
    h2 = jax.nn.relu(jnp.einsum("mtk,tkn->mn", pg, params["c2_w"])
                     + params["c2_b"])
    A = jax.nn.relu(h2 @ params["c3_w"] + params["c3_b"] + h)
    A3 = A.reshape(N, hw, CSTEM)
    logits = A3.mean(axis=1) @ params["fc_wT"] + params["fc_b"]
    target = labels if labels is not None else jnp.argmax(logits, axis=-1)
    alpha = params["fc_w"][target] / float(hw)
    cam = jax.nn.relu(jnp.einsum("nhc,nc->nh", A3, alpha))
    return logits, cam.reshape(N, ho, wo)


if __name__ == "__main__":
    key = jax.random.PRNGKey(0)
    pkey, xkey = jax.random.split(key)
    params = init_params(pkey, num_classes=8)

    imgs = jax.random.normal(xkey, (2, 3, 16, 16), jnp.float32)  # NCHW (PyTorch)
    labels = jnp.array([1, 3], dtype=jnp.int32)

    # labeled path (scalar-prefetched targets) + CAM
    logits, cams = resnet_gcn_forward(params, imgs, labels, return_cam=True)
    jax.block_until_ready((logits, cams))
    assert logits.shape == (2, 8) and cams.shape == (2, 8, 8)

    ref_logits, ref_cams = _reference_forward(params, imgs, labels)
    assert float(jnp.max(jnp.abs(logits - ref_logits))) < 1e-3
    assert float(jnp.max(jnp.abs(cams - ref_cams))) < 1e-3

    # unlabeled path (in-kernel argmax), logits only
    logits2 = resnet_gcn_forward(params, imgs)
    jax.block_until_ready(logits2)
    assert float(jnp.max(jnp.abs(logits2 - ref_logits))) < 1e-3

    print("KERNEL_OK")
</pallas_src>

<mosaic_0001>
module attributes {stable_mosaic.version = 11 : i64} {
  func.func @_fused_kernel(%arg0: i32, %arg1: memref<2xi32, #tpu.memory_space<smem>>, %arg2: memref<1x64x32xf32, #tpu.memory_space<vmem>>, %arg3: memref<32x16xf32, #tpu.memory_space<vmem>>, %arg4: memref<1x16xf32, #tpu.memory_space<vmem>>, %arg5: memref<16x32xf32, #tpu.memory_space<vmem>>, %arg6: memref<1x32xf32, #tpu.memory_space<vmem>>, %arg7: memref<9x32x32xf32, #tpu.memory_space<vmem>>, %arg8: memref<1x32xf32, #tpu.memory_space<vmem>>, %arg9: memref<32x16xf32, #tpu.memory_space<vmem>>, %arg10: memref<1x16xf32, #tpu.memory_space<vmem>>, %arg11: memref<16x8xf32, #tpu.memory_space<vmem>>, %arg12: memref<8x16xf32, #tpu.memory_space<vmem>>, %arg13: memref<1x8xf32, #tpu.memory_space<vmem>>, %arg14: memref<1x1x8xf32, #tpu.memory_space<vmem>>, %arg15: memref<1x1x64xf32, #tpu.memory_space<vmem>>, %arg16: memref<10x10x32xf32, #tpu.memory_space<vmem>>) attributes {dimension_semantics = [#tpu.dimension_semantics<parallel>], iteration_bounds = array<i64: 2>, scalar_prefetch = 1 : i64, scratch_operands = 1 : i64, tpu.core_type = #tpu.core_type<tc>, window_params = [{transform_indices = @transform_0, window_bounds = array<i64: 1, 64, 32>}, {pipeline_mode = #tpu.pipeline_mode<synchronous>, transform_indices = @transform_1, window_bounds = array<i64: 32, 16>}, {pipeline_mode = #tpu.pipeline_mode<synchronous>, transform_indices = @transform_2, window_bounds = array<i64: 1, 16>}, {pipeline_mode = #tpu.pipeline_mode<synchronous>, transform_indices = @transform_3, window_bounds = array<i64: 16, 32>}, {pipeline_mode = #tpu.pipeline_mode<synchronous>, transform_indices = @transform_4, window_bounds = array<i64: 1, 32>}, {pipeline_mode = #tpu.pipeline_mode<synchronous>, transform_indices = @transform_5, window_bounds = array<i64: 9, 32, 32>}, {pipeline_mode = #tpu.pipeline_mode<synchronous>, transform_indices = @transform_6, window_bounds = array<i64: 1, 32>}, {pipeline_mode = #tpu.pipeline_mode<synchronous>, transform_indices = @transform_7, window_bounds = array<i64: 32, 16>}, {pipeline_mode = #tpu.pipeline_mode<synchronous>, transform_indices = @transform_8, window_bounds = array<i64: 1, 16>}, {pipeline_mode = #tpu.pipeline_mode<synchronous>, transform_indices = @transform_9, window_bounds = array<i64: 16, 8>}, {pipeline_mode = #tpu.pipeline_mode<synchronous>, transform_indices = @transform_10, window_bounds = array<i64: 8, 16>}, {pipeline_mode = #tpu.pipeline_mode<synchronous>, transform_indices = @transform_11, window_bounds = array<i64: 1, 8>}, {transform_indices = @transform_12, window_bounds = array<i64: 1, 1, 8>}, {transform_indices = @transform_13, window_bounds = array<i64: 1, 1, 64>}]} {
    %c0 = arith.constant 0 : index
    %c0_0 = arith.constant 0 : index
    %c0_1 = arith.constant 0 : index
    %0 = vector.load %arg2[%c0, %c0_0, %c0_1] : memref<1x64x32xf32, #tpu.memory_space<vmem>>, vector<1x64x32xf32>
    %1 = vector.shape_cast %0 : vector<1x64x32xf32> to vector<64x32xf32>
    %c0_2 = arith.constant 0 : index
    %c0_3 = arith.constant 0 : index
    %2 = vector.load %arg3[%c0_2, %c0_3] : memref<32x16xf32, #tpu.memory_space<vmem>>, vector<32x16xf32>
    %cst = arith.constant dense<0.000000e+00> : vector<64x16xf32>
    %3 = tpu.matmul %1, %2, %cst {dimension_numbers = #tpu.dot_dimension_numbers<[1], [0], [0], [1], [0, 0, 1, 1], [], []>} : vector<64x32xf32>, vector<32x16xf32>, vector<64x16xf32> -> vector<64x16xf32>
    %c0_4 = arith.constant 0 : index
    %c0_5 = arith.constant 0 : index
    %4 = vector.load %arg4[%c0_4, %c0_5] : memref<1x16xf32, #tpu.memory_space<vmem>>, vector<1x16xf32>
    %5 = vector.broadcast %4 : vector<1x16xf32> to vector<64x16xf32>
    %6 = arith.addf %3, %5 : vector<64x16xf32>
    %cst_6 = arith.constant 0.000000e+00 : f32
    %7 = vector.broadcast %cst_6 : f32 to vector<64x16xf32>
    %8 = arith.maximumf %6, %7 : vector<64x16xf32>
    %c0_7 = arith.constant 0 : index
    %c0_8 = arith.constant 0 : index
    %9 = vector.load %arg5[%c0_7, %c0_8] : memref<16x32xf32, #tpu.memory_space<vmem>>, vector<16x32xf32>
    %cst_9 = arith.constant dense<0.000000e+00> : vector<64x32xf32>
    %10 = tpu.matmul %8, %9, %cst_9 {dimension_numbers = #tpu.dot_dimension_numbers<[1], [0], [0], [1], [0, 0, 1, 1], [], []>} : vector<64x16xf32>, vector<16x32xf32>, vector<64x32xf32> -> vector<64x32xf32>
    %c0_10 = arith.constant 0 : index
    %c0_11 = arith.constant 0 : index
    %11 = vector.load %arg6[%c0_10, %c0_11] : memref<1x32xf32, #tpu.memory_space<vmem>>, vector<1x32xf32>
    %12 = vector.broadcast %11 : vector<1x32xf32> to vector<64x32xf32>
    %13 = arith.addf %10, %12 : vector<64x32xf32>
    %cst_12 = arith.constant 0.000000e+00 : f32
    %14 = vector.broadcast %cst_12 : f32 to vector<64x32xf32>
    %15 = arith.maximumf %13, %14 : vector<64x32xf32>
    %cst_13 = arith.constant 0.000000e+00 : f32
    %16 = vector.broadcast %cst_13 : f32 to vector<10x10x32xf32>
    %c0_14 = arith.constant 0 : index
    %c0_15 = arith.constant 0 : index
    %c0_16 = arith.constant 0 : index
    %17 = vector.load %arg16[%c0_14, %c0_15, %c0_16] : memref<10x10x32xf32, #tpu.memory_space<vmem>>, vector<10x10x32xf32>
    tpu.vector_store %arg16[%c0_14, %c0_15, %c0_16], %16 {strides = array<i32>} : memref<10x10x32xf32, #tpu.memory_space<vmem>>, vector<10x10x32xf32>,
    %18 = vector.shape_cast %15 : vector<64x32xf32> to vector<8x8x32xf32>
    %c1 = arith.constant 1 : index
    %c1_17 = arith.constant 1 : index
    %c0_18 = arith.constant 0 : index
    %19 = vector.load %arg16[%c1, %c1_17, %c0_18] : memref<10x10x32xf32, #tpu.memory_space<vmem>>, vector<8x8x32xf32>
    tpu.vector_store %arg16[%c1, %c1_17, %c0_18], %18 {strides = array<i32>} : memref<10x10x32xf32, #tpu.memory_space<vmem>>, vector<8x8x32xf32>,
    %cst_19 = arith.constant 0.000000e+00 : f32
    %20 = vector.broadcast %cst_19 : f32 to vector<64x32xf32>
    %c0_20 = arith.constant 0 : index
    %c0_21 = arith.constant 0 : index
    %c0_22 = arith.constant 0 : index
    %21 = vector.load %arg16[%c0_20, %c0_21, %c0_22] : memref<10x10x32xf32, #tpu.memory_space<vmem>>, vector<8x8x32xf32>
    %22 = vector.shape_cast %21 : vector<8x8x32xf32> to vector<64x32xf32>
    %c0_23 = arith.constant 0 : index
    %c0_24 = arith.constant 0 : index
    %c0_25 = arith.constant 0 : index
    %23 = vector.load %arg7[%c0_23, %c0_24, %c0_25] : memref<9x32x32xf32, #tpu.memory_space<vmem>>, vector<1x32x32xf32>
    %24 = vector.shape_cast %23 : vector<1x32x32xf32> to vector<32x32xf32>
    %cst_26 = arith.constant dense<0.000000e+00> : vector<64x32xf32>
    %25 = tpu.matmul %22, %24, %cst_26 {dimension_numbers = #tpu.dot_dimension_numbers<[1], [0], [0], [1], [0, 0, 1, 1], [], []>} : vector<64x32xf32>, vector<32x32xf32>, vector<64x32xf32> -> vector<64x32xf32>
    %26 = arith.addf %20, %25 : vector<64x32xf32>
    %c0_27 = arith.constant 0 : index
    %c1_28 = arith.constant 1 : index
    %c0_29 = arith.constant 0 : index
    %27 = vector.load %arg16[%c0_27, %c1_28, %c0_29] : memref<10x10x32xf32, #tpu.memory_space<vmem>>, vector<8x8x32xf32>
    %28 = vector.shape_cast %27 : vector<8x8x32xf32> to vector<64x32xf32>
    %c1_30 = arith.constant 1 : index
    %c0_31 = arith.constant 0 : index
    %c0_32 = arith.constant 0 : index
    %29 = vector.load %arg7[%c1_30, %c0_31, %c0_32] : memref<9x32x32xf32, #tpu.memory_space<vmem>>, vector<1x32x32xf32>
    %30 = vector.shape_cast %29 : vector<1x32x32xf32> to vector<32x32xf32>
    %cst_33 = arith.constant dense<0.000000e+00> : vector<64x32xf32>
    %31 = tpu.matmul %28, %30, %cst_33 {dimension_numbers = #tpu.dot_dimension_numbers<[1], [0], [0], [1], [0, 0, 1, 1], [], []>} : vector<64x32xf32>, vector<32x32xf32>, vector<64x32xf32> -> vector<64x32xf32>
    %32 = arith.addf %26, %31 : vector<64x32xf32>
    %c0_34 = arith.constant 0 : index
    %c2 = arith.constant 2 : index
    %c0_35 = arith.constant 0 : index
    %33 = vector.load %arg16[%c0_34, %c2, %c0_35] : memref<10x10x32xf32, #tpu.memory_space<vmem>>, vector<8x8x32xf32>
    %34 = vector.shape_cast %33 : vector<8x8x32xf32> to vector<64x32xf32>
    %c2_36 = arith.constant 2 : index
    %c0_37 = arith.constant 0 : index
    %c0_38 = arith.constant 0 : index
    %35 = vector.load %arg7[%c2_36, %c0_37, %c0_38] : memref<9x32x32xf32, #tpu.memory_space<vmem>>, vector<1x32x32xf32>
    %36 = vector.shape_cast %35 : vector<1x32x32xf32> to vector<32x32xf32>
    %cst_39 = arith.constant dense<0.000000e+00> : vector<64x32xf32>
    %37 = tpu.matmul %34, %36, %cst_39 {dimension_numbers = #tpu.dot_dimension_numbers<[1], [0], [0], [1], [0, 0, 1, 1], [], []>} : vector<64x32xf32>, vector<32x32xf32>, vector<64x32xf32> -> vector<64x32xf32>
    %38 = arith.addf %32, %37 : vector<64x32xf32>
    %c1_40 = arith.constant 1 : index
    %c0_41 = arith.constant 0 : index
    %c0_42 = arith.constant 0 : index
    %39 = vector.load %arg16[%c1_40, %c0_41, %c0_42] : memref<10x10x32xf32, #tpu.memory_space<vmem>>, vector<8x8x32xf32>
    %40 = vector.shape_cast %39 : vector<8x8x32xf32> to vector<64x32xf32>
    %c3 = arith.constant 3 : index
    %c0_43 = arith.constant 0 : index
    %c0_44 = arith.constant 0 : index
    %41 = vector.load %arg7[%c3, %c0_43, %c0_44] : memref<9x32x32xf32, #tpu.memory_space<vmem>>, vector<1x32x32xf32>
    %42 = vector.shape_cast %41 : vector<1x32x32xf32> to vector<32x32xf32>
    %cst_45 = arith.constant dense<0.000000e+00> : vector<64x32xf32>
    %43 = tpu.matmul %40, %42, %cst_45 {dimension_numbers = #tpu.dot_dimension_numbers<[1], [0], [0], [1], [0, 0, 1, 1], [], []>} : vector<64x32xf32>, vector<32x32xf32>, vector<64x32xf32> -> vector<64x32xf32>
    %44 = arith.addf %38, %43 : vector<64x32xf32>
    %c1_46 = arith.constant 1 : index
    %c1_47 = arith.constant 1 : index
    %c0_48 = arith.constant 0 : index
    %45 = vector.load %arg16[%c1_46, %c1_47, %c0_48] : memref<10x10x32xf32, #tpu.memory_space<vmem>>, vector<8x8x32xf32>
    %46 = vector.shape_cast %45 : vector<8x8x32xf32> to vector<64x32xf32>
    %c4 = arith.constant 4 : index
    %c0_49 = arith.constant 0 : index
    %c0_50 = arith.constant 0 : index
    %47 = vector.load %arg7[%c4, %c0_49, %c0_50] : memref<9x32x32xf32, #tpu.memory_space<vmem>>, vector<1x32x32xf32>
    %48 = vector.shape_cast %47 : vector<1x32x32xf32> to vector<32x32xf32>
    %cst_51 = arith.constant dense<0.000000e+00> : vector<64x32xf32>
    %49 = tpu.matmul %46, %48, %cst_51 {dimension_numbers = #tpu.dot_dimension_numbers<[1], [0], [0], [1], [0, 0, 1, 1], [], []>} : vector<64x32xf32>, vector<32x32xf32>, vector<64x32xf32> -> vector<64x32xf32>
    %50 = arith.addf %44, %49 : vector<64x32xf32>
    %c1_52 = arith.constant 1 : index
    %c2_53 = arith.constant 2 : index
    %c0_54 = arith.constant 0 : index
    %51 = vector.load %arg16[%c1_52, %c2_53, %c0_54] : memref<10x10x32xf32, #tpu.memory_space<vmem>>, vector<8x8x32xf32>
    %52 = vector.shape_cast %51 : vector<8x8x32xf32> to vector<64x32xf32>
    %c5 = arith.constant 5 : index
    %c0_55 = arith.constant 0 : index
    %c0_56 = arith.constant 0 : index
    %53 = vector.load %arg7[%c5, %c0_55, %c0_56] : memref<9x32x32xf32, #tpu.memory_space<vmem>>, vector<1x32x32xf32>
    %54 = vector.shape_cast %53 : vector<1x32x32xf32> to vector<32x32xf32>
    %cst_57 = arith.constant dense<0.000000e+00> : vector<64x32xf32>
    %55 = tpu.matmul %52, %54, %cst_57 {dimension_numbers = #tpu.dot_dimension_numbers<[1], [0], [0], [1], [0, 0, 1, 1], [], []>} : vector<64x32xf32>, vector<32x32xf32>, vector<64x32xf32> -> vector<64x32xf32>
    %56 = arith.addf %50, %55 : vector<64x32xf32>
    %c2_58 = arith.constant 2 : index
    %c0_59 = arith.constant 0 : index
    %c0_60 = arith.constant 0 : index
    %57 = vector.load %arg16[%c2_58, %c0_59, %c0_60] : memref<10x10x32xf32, #tpu.memory_space<vmem>>, vector<8x8x32xf32>
    %58 = vector.shape_cast %57 : vector<8x8x32xf32> to vector<64x32xf32>
    %c6 = arith.constant 6 : index
    %c0_61 = arith.constant 0 : index
    %c0_62 = arith.constant 0 : index
    %59 = vector.load %arg7[%c6, %c0_61, %c0_62] : memref<9x32x32xf32, #tpu.memory_space<vmem>>, vector<1x32x32xf32>
    %60 = vector.shape_cast %59 : vector<1x32x32xf32> to vector<32x32xf32>
    %cst_63 = arith.constant dense<0.000000e+00> : vector<64x32xf32>
    %61 = tpu.matmul %58, %60, %cst_63 {dimension_numbers = #tpu.dot_dimension_numbers<[1], [0], [0], [1], [0, 0, 1, 1], [], []>} : vector<64x32xf32>, vector<32x32xf32>, vector<64x32xf32> -> vector<64x32xf32>
    %62 = arith.addf %56, %61 : vector<64x32xf32>
    %c2_64 = arith.constant 2 : index
    %c1_65 = arith.constant 1 : index
    %c0_66 = arith.constant 0 : index
    %63 = vector.load %arg16[%c2_64, %c1_65, %c0_66] : memref<10x10x32xf32, #tpu.memory_space<vmem>>, vector<8x8x32xf32>
    %64 = vector.shape_cast %63 : vector<8x8x32xf32> to vector<64x32xf32>
    %c7 = arith.constant 7 : index
    %c0_67 = arith.constant 0 : index
    %c0_68 = arith.constant 0 : index
    %65 = vector.load %arg7[%c7, %c0_67, %c0_68] : memref<9x32x32xf32, #tpu.memory_space<vmem>>, vector<1x32x32xf32>
    %66 = vector.shape_cast %65 : vector<1x32x32xf32> to vector<32x32xf32>
    %cst_69 = arith.constant dense<0.000000e+00> : vector<64x32xf32>
    %67 = tpu.matmul %64, %66, %cst_69 {dimension_numbers = #tpu.dot_dimension_numbers<[1], [0], [0], [1], [0, 0, 1, 1], [], []>} : vector<64x32xf32>, vector<32x32xf32>, vector<64x32xf32> -> vector<64x32xf32>
    %68 = arith.addf %62, %67 : vector<64x32xf32>
    %c2_70 = arith.constant 2 : index
    %c2_71 = arith.constant 2 : index
    %c0_72 = arith.constant 0 : index
    %69 = vector.load %arg16[%c2_70, %c2_71, %c0_72] : memref<10x10x32xf32, #tpu.memory_space<vmem>>, vector<8x8x32xf32>
    %70 = vector.shape_cast %69 : vector<8x8x32xf32> to vector<64x32xf32>
    %c8 = arith.constant 8 : index
    %c0_73 = arith.constant 0 : index
    %c0_74 = arith.constant 0 : index
    %71 = vector.load %arg7[%c8, %c0_73, %c0_74] : memref<9x32x32xf32, #tpu.memory_space<vmem>>, vector<1x32x32xf32>
    %72 = vector.shape_cast %71 : vector<1x32x32xf32> to vector<32x32xf32>
    %cst_75 = arith.constant dense<0.000000e+00> : vector<64x32xf32>
    %73 = tpu.matmul %70, %72, %cst_75 {dimension_numbers = #tpu.dot_dimension_numbers<[1], [0], [0], [1], [0, 0, 1, 1], [], []>} : vector<64x32xf32>, vector<32x32xf32>, vector<64x32xf32> -> vector<64x32xf32>
    %74 = arith.addf %68, %73 : vector<64x32xf32>
    %c0_76 = arith.constant 0 : index
    %c0_77 = arith.constant 0 : index
    %75 = vector.load %arg8[%c0_76, %c0_77] : memref<1x32xf32, #tpu.memory_space<vmem>>, vector<1x32xf32>
    %76 = vector.broadcast %75 : vector<1x32xf32> to vector<64x32xf32>
    %77 = arith.addf %74, %76 : vector<64x32xf32>
    %cst_78 = arith.constant 0.000000e+00 : f32
    %78 = vector.broadcast %cst_78 : f32 to vector<64x32xf32>
    %79 = arith.maximumf %77, %78 : vector<64x32xf32>
    %c0_79 = arith.constant 0 : index
    %c0_80 = arith.constant 0 : index
    %80 = vector.load %arg9[%c0_79, %c0_80] : memref<32x16xf32, #tpu.memory_space<vmem>>, vector<32x16xf32>
    %cst_81 = arith.constant dense<0.000000e+00> : vector<64x16xf32>
    %81 = tpu.matmul %79, %80, %cst_81 {dimension_numbers = #tpu.dot_dimension_numbers<[1], [0], [0], [1], [0, 0, 1, 1], [], []>} : vector<64x32xf32>, vector<32x16xf32>, vector<64x16xf32> -> vector<64x16xf32>
    %c0_82 = arith.constant 0 : index
    %c0_83 = arith.constant 0 : index
    %82 = vector.load %arg10[%c0_82, %c0_83] : memref<1x16xf32, #tpu.memory_space<vmem>>, vector<1x16xf32>
    %83 = vector.broadcast %82 : vector<1x16xf32> to vector<64x16xf32>
    %84 = arith.addf %81, %83 : vector<64x16xf32>
    %85 = arith.addf %84, %8 : vector<64x16xf32>
    %cst_84 = arith.constant 0.000000e+00 : f32
    %86 = vector.broadcast %cst_84 : f32 to vector<64x16xf32>
    %87 = arith.maximumf %85, %86 : vector<64x16xf32>
    %cst_85 = arith.constant dense<0.000000e+00> : vector<16xf32>
    %88 = vector.multi_reduction <add>, %87, %cst_85 [0] : vector<64x16xf32> to vector<16xf32>
    %89 = vector.shape_cast %88 : vector<16xf32> to vector<1x16xf32>
    %cst_86 = arith.constant 1.562500e-02 : f32
    %90 = vector.broadcast %cst_86 : f32 to vector<1x16xf32>
    %91 = arith.mulf %89, %90 : vector<1x16xf32>
    %c0_87 = arith.constant 0 : index
    %c0_88 = arith.constant 0 : index
    %92 = vector.load %arg11[%c0_87, %c0_88] : memref<16x8xf32, #tpu.memory_space<vmem>>, vector<16x8xf32>
    %cst_89 = arith.constant dense<0.000000e+00> : vector<1x8xf32>
    %93 = tpu.matmul %91, %92, %cst_89 {dimension_numbers = #tpu.dot_dimension_numbers<[1], [0], [0], [1], [0, 0, 1, 1], [], []>} : vector<1x16xf32>, vector<16x8xf32>, vector<1x8xf32> -> vector<1x8xf32>
    %c0_90 = arith.constant 0 : index
    %c0_91 = arith.constant 0 : index
    %94 = vector.load %arg13[%c0_90, %c0_91] : memref<1x8xf32, #tpu.memory_space<vmem>>, vector<1x8xf32>
    %95 = arith.addf %93, %94 : vector<1x8xf32>
    %c0_92 = arith.constant 0 : index
    %c0_93 = arith.constant 0 : index
    %c0_94 = arith.constant 0 : index
    %96 = vector.load %arg14[%c0_92, %c0_93, %c0_94] : memref<1x1x8xf32, #tpu.memory_space<vmem>>, vector<1x1x8xf32>
    %97 = vector.shape_cast %96 : vector<1x1x8xf32> to vector<1x8xf32>
    %98 = vector.shape_cast %95 : vector<1x8xf32> to vector<1x1x8xf32>
    tpu.vector_store %arg14[%c0_92, %c0_93, %c0_94], %98 {strides = array<i32>} : memref<1x1x8xf32, #tpu.memory_space<vmem>>, vector<1x1x8xf32>,
    %99 = tpu.iota {dimensions = array<i32: 1>} : vector<1x8xi32>
    %100 = arith.index_cast %arg0 : i32 to index
    %101 = memref.load %arg1[%100] : memref<2xi32, #tpu.memory_space<smem>>
    %102 = vector.broadcast %101 : i32 to vector<1x8xi32>
    %103 = arith.cmpi eq, %99, %102 : vector<1x8xi32>
    %104 = arith.extui %103 : vector<1x8xi1> to vector<1x8xi32>
    %105 = arith.sitofp %104 : vector<1x8xi32> to vector<1x8xf32>
    %c0_95 = arith.constant 0 : index
    %c0_96 = arith.constant 0 : index
    %106 = vector.load %arg12[%c0_95, %c0_96] : memref<8x16xf32, #tpu.memory_space<vmem>>, vector<8x16xf32>
    %cst_97 = arith.constant dense<0.000000e+00> : vector<1x16xf32>
    %107 = tpu.matmul %105, %106, %cst_97 {dimension_numbers = #tpu.dot_dimension_numbers<[1], [0], [0], [1], [0, 0, 1, 1], [], []>} : vector<1x8xf32>, vector<8x16xf32>, vector<1x16xf32> -> vector<1x16xf32>
    %cst_98 = arith.constant 1.562500e-02 : f32
    %108 = vector.broadcast %cst_98 : f32 to vector<1x16xf32>
    %109 = arith.mulf %107, %108 : vector<1x16xf32>
    %cst_99 = arith.constant dense<0.000000e+00> : vector<1x64xf32>
    %110 = tpu.matmul %109, %87, %cst_99 {dimension_numbers = #tpu.dot_dimension_numbers<[1], [1], [0], [0], [0, 0, 1, 0], [], []>} : vector<1x16xf32>, vector<64x16xf32>, vector<1x64xf32> -> vector<1x64xf32>
    %cst_100 = arith.constant 0.000000e+00 : f32
    %111 = vector.broadcast %cst_100 : f32 to vector<1x64xf32>
    %112 = arith.maximumf %110, %111 : vector<1x64xf32>
    %c0_101 = arith.constant 0 : index
    %c0_102 = arith.constant 0 : index
    %c0_103 = arith.constant 0 : index
    %113 = vector.load %arg15[%c0_101, %c0_102, %c0_103] : memref<1x1x64xf32, #tpu.memory_space<vmem>>, vector<1x1x64xf32>
    %114 = vector.shape_cast %113 : vector<1x1x64xf32> to vector<1x64xf32>
    %115 = vector.shape_cast %112 : vector<1x64xf32> to vector<1x1x64xf32>
    tpu.vector_store %arg15[%c0_101, %c0_102, %c0_103], %115 {strides = array<i32>} : memref<1x1x64xf32, #tpu.memory_space<vmem>>, vector<1x1x64xf32>,
    return
  }
  func.func @transform_0(%arg0: i32, %arg1: memref<2xi32, #tpu.memory_space<smem>>) -> (i32, i32, i32) {
    %c0_i32 = arith.constant 0 : i32
    %c0_i32_0 = arith.constant 0 : i32
    %c0_i32_1 = arith.constant 0 : i32
    return %arg0, %c0_i32, %c0_i32_0 : i32, i32, i32
  }
  func.func @transform_1(%arg0: i32, %arg1: memref<2xi32, #tpu.memory_space<smem>>) -> (i32, i32) {
    %c0_i32 = arith.constant 0 : i32
    %c0_i32_0 = arith.constant 0 : i32
    %c0_i32_1 = arith.constant 0 : i32
    return %c0_i32, %c0_i32_0 : i32, i32
  }
  func.func @transform_2(%arg0: i32, %arg1: memref<2xi32, #tpu.memory_space<smem>>) -> (i32, i32) {
    %c0_i32 = arith.constant 0 : i32
    %c0_i32_0 = arith.constant 0 : i32
    %c0_i32_1 = arith.constant 0 : i32
    return %c0_i32, %c0_i32_0 : i32, i32
  }
  func.func @transform_3(%arg0: i32, %arg1: memref<2xi32, #tpu.memory_space<smem>>) -> (i32, i32) {
    %c0_i32 = arith.constant 0 : i32
    %c0_i32_0 = arith.constant 0 : i32
    %c0_i32_1 = arith.constant 0 : i32
    return %c0_i32, %c0_i32_0 : i32, i32
  }
  func.func @transform_4(%arg0: i32, %arg1: memref<2xi32, #tpu.memory_space<smem>>) -> (i32, i32) {
    %c0_i32 = arith.constant 0 : i32
    %c0_i32_0 = arith.constant 0 : i32
    %c0_i32_1 = arith.constant 0 : i32
    return %c0_i32, %c0_i32_0 : i32, i32
  }
  func.func @transform_5(%arg0: i32, %arg1: memref<2xi32, #tpu.memory_space<smem>>) -> (i32, i32, i32) {
    %c0_i32 = arith.constant 0 : i32
    %c0_i32_0 = arith.constant 0 : i32
    %c0_i32_1 = arith.constant 0 : i32
    %c0_i32_2 = arith.constant 0 : i32
    return %c0_i32, %c0_i32_0, %c0_i32_1 : i32, i32, i32
  }
  func.func @transform_6(%arg0: i32, %arg1: memref<2xi32, #tpu.memory_space<smem>>) -> (i32, i32) {
    %c0_i32 = arith.constant 0 : i32
    %c0_i32_0 = arith.constant 0 : i32
    %c0_i32_1 = arith.constant 0 : i32
    return %c0_i32, %c0_i32_0 : i32, i32
  }
  func.func @transform_7(%arg0: i32, %arg1: memref<2xi32, #tpu.memory_space<smem>>) -> (i32, i32) {
    %c0_i32 = arith.constant 0 : i32
    %c0_i32_0 = arith.constant 0 : i32
    %c0_i32_1 = arith.constant 0 : i32
    return %c0_i32, %c0_i32_0 : i32, i32
  }
  func.func @transform_8(%arg0: i32, %arg1: memref<2xi32, #tpu.memory_space<smem>>) -> (i32, i32) {
    %c0_i32 = arith.constant 0 : i32
    %c0_i32_0 = arith.constant 0 : i32
    %c0_i32_1 = arith.constant 0 : i32
    return %c0_i32, %c0_i32_0 : i32, i32
  }
  func.func @transform_9(%arg0: i32, %arg1: memref<2xi32, #tpu.memory_space<smem>>) -> (i32, i32) {
    %c0_i32 = arith.constant 0 : i32
    %c0_i32_0 = arith.constant 0 : i32
    %c0_i32_1 = arith.constant 0 : i32
    return %c0_i32, %c0_i32_0 : i32, i32
  }
  func.func @transform_10(%arg0: i32, %arg1: memref<2xi32, #tpu.memory_space<smem>>) -> (i32, i32) {
    %c0_i32 = arith.constant 0 : i32
    %c0_i32_0 = arith.constant 0 : i32
    %c0_i32_1 = arith.constant 0 : i32
    return %c0_i32, %c0_i32_0 : i32, i32
  }
  func.func @transform_11(%arg0: i32, %arg1: memref<2xi32, #tpu.memory_space<smem>>) -> (i32, i32) {
    %c0_i32 = arith.constant 0 : i32
    %c0_i32_0 = arith.constant 0 : i32
    %c0_i32_1 = arith.constant 0 : i32
    return %c0_i32, %c0_i32_0 : i32, i32
  }
  func.func @transform_12(%arg0: i32, %arg1: memref<2xi32, #tpu.memory_space<smem>>) -> (i32, i32, i32) {
    %c0_i32 = arith.constant 0 : i32
    %c0_i32_0 = arith.constant 0 : i32
    %c0_i32_1 = arith.constant 0 : i32
    return %arg0, %c0_i32, %c0_i32_0 : i32, i32, i32
  }
  func.func @transform_13(%arg0: i32, %arg1: memref<2xi32, #tpu.memory_space<smem>>) -> (i32, i32, i32) {
    %c0_i32 = arith.constant 0 : i32
    %c0_i32_0 = arith.constant 0 : i32
    %c0_i32_1 = arith.constant 0 : i32
    return %arg0, %c0_i32, %c0_i32_0 : i32, i32, i32
  }
}

</mosaic_0001>

<bundles_post_ra>
// kernel: tpu_custom_call.1
= control target key start
LH: loop header
LB: loop body
LE: loop exit
PB: predicated region body
PF: predicated region fallthrough
CT: control target
= control target key end

     0   :  { %s2125_s16 = smov [#allocation4]   ;;  %s2754_s0 = inlined_call_operand.vmem [shape: s32[2], index: 0, kind: input, shape index: {}]   ;;  %s2755_s1 = inlined_call_operand.vmem [shape: f32[2,64,32], index: 1, kind: input, shape index: {}]   ;;  %s2756_s2 = inlined_call_operand.vmem [shape: f32[32,16], index: 2, kind: input, shape index: {}]   ;;  %s2757_s3 = inlined_call_operand.vmem [shape: f32[1,16], index: 3, kind: input, shape index: {}]   ;;  %s2758_s4 = inlined_call_operand.vmem [shape: f32[16,32], index: 4, kind: input, shape index: {}]   ;;  %s2759_s5 = inlined_call_operand.vmem [shape: f32[1,32], index: 5, kind: input, shape index: {}]   ;;  %s2760_s6 = inlined_call_operand.hbm [shape: f32[9,32,32], index: 6, kind: input, shape index: {}]   ;;  %s2761_s7 = inlined_call_operand.vmem [shape: f32[1,32], index: 7, kind: input, shape index: {}]   ;;  %s2762_s8 = inlined_call_operand.vmem [shape: f32[32,16], index: 8, kind: input, shape index: {}]   ;;  %s2763_s9 = inlined_call_operand.vmem [shape: f32[1,16], index: 9, kind: input, shape index: {}]   ;;  %s2764_s10 = inlined_call_operand.vmem [shape: f32[16,8], index: 10, kind: input, shape index: {}]   ;;  %s2765_s11 = inlined_call_operand.vmem [shape: f32[8,16], index: 11, kind: input, shape index: {}]   ;;  %s2766_s12 = inlined_call_operand.vmem [shape: f32[1,8], index: 12, kind: input, shape index: {}]   ;;  %s2767_s13 = inlined_call_operand.hbm [shape: f32[2,1,8], index: 13, kind: output, shape index: {0}]   ;;  %s2768_s14 = inlined_call_operand.hbm [shape: f32[2,1,64], index: 14, kind: output, shape index: {1}]  }
   0x1   :  { %2782 = sst [smem:[#allocation19_spill]] %s2755_s1  ;;  %s21_s15 = sshll.u32 %s2754_s0, 4  ;;  %s22_s15 = int_to_ptr.vmem [resolvable:$true] %s21_s15 }
   0x2   :  { %2783 = sst [smem:[#allocation20_spill]] %s2756_s2 }
   0x3   :  { %2784 = sst [smem:[#allocation21_spill]] %s2757_s3 }
   0x4   :  { %2785 = sst [smem:[#allocation22_spill]] %s2760_s6 }
   0x5   :  { %24 = dma.vmem_to_smem %s22_s15, 16, %s2125_s16, [#allocation3] }
   0x6   :  { %2095 = dma.done.wait [#allocation3], 16 }
   0x7   :  { %2096 = vsyncadd [#allocation3], 4294967280 }
   0x8   :  { %27 = sfence }
   0x9   :  { %28 = vsyncpa [#allocation6], 0 }
   0xa   :  { %29 = vsyncpa [#allocation7], 0 }
   0xb   :  { %31 = vsyncpa [#allocation7 + $0x1], 0 }
   0xc   :  { %32 = vsyncpa [#allocation10], 0 }
   0xd   :  { %34 = vsyncpa [#allocation10 + $0x1], 0  ;;  %s2208_s17 = smov 0   ;;  %s2210_s18 = smov 0  }
   0xe   :  { %s2212_s19 = smov 0   ;;  %s2214_s20 = smov 0  }
   0xf LB: > { %2786 = sst [smem:[#allocation15_spill]] %s2119_s19  ;;  %s2229_s0 = sadd.s32 4294967295, %s2123_s20   ;;  %s2123_s20 = sphi %s2214_s20, %s2806_s20   ;;  %s2119_s19 = sphi %s2212_s19, %s2808_s19   ;;  %s2115_s18 = sphi %s2210_s18, %s2810_s18   ;;  %s2111_s17 = sphi %s2208_s17, %s2809_s17  }
  0x10   : > { %s1799_s21 = sadd.s32 4294967294, %s2123_s20   ;;  %s2233_s22 = sadd.s32 1, %s2123_s20  }
  0x11   : > { %2787 = sst [smem:[#allocation16_spill]] %s2233_s22  ;;  %s304_s23 = sadd.s32 1, %s2119_s19 }
  0x12   : > { %s301_s24 = ssub.s32 %s2123_s20, %s2233_s22  ;;  %p314_p0 = scmp.ne.s32.totalorder %s2119_s19, %s2115_s18 }
  0x13   : > { %p302_p1 = scmp.eq.s32.totalorder %s301_s24, 0  ;;  %p315_p2 = scmp.eq.s32.totalorder %s2229_s0, 1 }
  0x14   : > { %p320_p3 = scmp.ne.s32.totalorder %s2115_s18, %s2111_s17  ;;  %p321_p4 = scmp.eq.s32.totalorder %s1799_s21, 1 }
  0x15   : > { %s2244_s25 = scalar_select %p302_p1, %s2119_s19, %s304_s23  }
  0x16   : > { %p2246_p5 = por %p315_p2, %p314_p0  ;;  %p2250_p6 = por %p321_p4, %p320_p3 }
  0x17   : > { %2788 = sst [smem:[#allocation17_spill]] %s2244_s25  ;;  %p1800_p7 = scmp.ge.s32.totalorder %s2123_s20, 1 }
  0x18   : > { %p354_p8 = scmp.lt.s32.totalorder %s2123_s20, 3  ;;  %p1937_p9 = scmp.eq.s32.totalorder %s2229_s0, 0 }
  0x19   : > { %s2791_s6 = sld [smem:[#allocation22_spill]]  ;;  %s2126_s15 = smov [#allocation5]  }
  0x1a   : > { %p355_p10 = pnand %p1800_p7, %p354_p8  ;;  %s379_s16 = sshll.u32 %s2126_s15, 4  ;;  %s380_s16 = int_to_ptr.vmem [resolvable:$true] %s379_s16 }
  0x1b   : > { %s2127_s21 = smov 128   ;;  %s2128_s23 = smov 8  }
  0x1c   : > { %p1926_p11 = pneg %p355_p10  ;;  %421 = sbr.rel (%p355_p10) target bundleno = 936 (0x3a8), region = 68 }
  0x1e   : > { %p1927_p12 = pnand %p1937_p9, %p1926_p11 }
  0x1f   : > { %s377_s30 = sshll.u32 %s2791_s6, 4  ;;  %s378_s30 = int_to_ptr.hbm [resolvable:$true] %s377_s30 }
  0x20   : > { %1929 = dma.hbm_to_vmem [thread:$0]  (!%p1927_p12), %s378_s30, 4608, %s380_s16, [#allocation6], %s2127_s21, %s2127_s21, %s2128_s23  }
  0x21   : > { %2098 = dma.done.wait (%p1937_p9), [#allocation6], 4608  }
  0x22   : > { %2100 = vsyncadd (%p1937_p9), [#allocation6], 4294962688  ;;  %p469_p13 = scmp.lt.s32.totalorder %s2229_s0, 1  ;;  %s2792_s2 = sld [smem:[#allocation20_spill]]  ;;  %vm490_vm0 = vcmask 261120   ;;  %v565_v12 = vld [vmem:[%s2758_s4 + $0x8] sm:$0xff] }
  0x23   : > { %s2793_s1 = sld [smem:[#allocation19_spill]]  ;;  %609 = vmatpush.msra.mxu1 %v565_v12  ;;  %v564_v13 = vld [vmem:[%s2758_s4] sm:$0xff]  ;;  %vm570_vm1 = vcmask 130048   ;;  %v698_v27 = vld [vmem:[#allocation5 + $0x38] sm:$0xff]  ;;  %v697_v29 = vld [vmem:[#allocation5 + $0x30] sm:$0xff]  ;;  %vm645_vm2 = vcmask 254976  }
  0x24   : > { %s470_s24 = scalar_select %p469_p13, %s2229_s0, 1  ;;  %v685_v28 = vld [vmem:[#allocation5 + $0x18] sm:$0xff]  ;;  %735 = vmatpush.msra.mxu2 %v698_v27  ;;  %v684_v30 = vld [vmem:[#allocation5 + $0x10] sm:$0xff]  ;;  %v2780_v44 = vmov 0.0   ;;  %v696_v45 = vld [vmem:[#allocation5 + $0x28] sm:$0xff]  ;;  %vm1599_vm3 = vcmask 64512  }
  0x25   : > { %610 = vmatpush.msra.mxu1 %v564_v13  ;;  %s2794_s3 = sld [smem:[#allocation21_spill]]  ;;  %800 = vmatpush.msra.mxu3 %v685_v28  ;;  %v841_v31 = vld [vmem:[#allocation5 + $0x58] sm:$0xff]  ;;  %647 = vst.msk [vmem:[#allocation2 + $0x10] sm:$0xff] %vm490_vm0, %v2780_v44  ;;  %v683_v46 = vld [vmem:[#allocation5 + $0x8] sm:$0xff]  ;;  %v840_v47 = vld [vmem:[#allocation5 + $0x50] sm:$0xff]  ;;  %vm1589_vm5 = vcmask 57344  }
  0x26   : > { %s1917_s28 = sshll.u32 %s470_s24, 6  ;;  %736 = vmatpush.msra.mxu2 %v697_v29  ;;  %648 = vst.msk [vmem:[#allocation2 + $0x18] sm:$0x3] %vm645_vm2, %v2780_v44  ;;  %v695_v48 = vld [vmem:[#allocation5 + $0x20] sm:$0xff]  ;;  %v839_v50 = vld [vmem:[#allocation5 + $0x48] sm:$0xff]  ;;  %v927_v55 = vld [vmem:[#allocation5 + $0x78] sm:$0xff] }
  0x27   : > { %878 = vmatpush.msrb.mxu1 %v841_v31  ;;  %801 = vmatpush.msra.mxu3 %v684_v30  ;;  %644 = vst.msk [vmem:[#allocation2] sm:$0xff] %vm490_vm0, %v2780_v44  ;;  %v682_v49 = vld [vmem:[#allocation5] sm:$0xff]  ;;  %v926_v56 = vld [vmem:[#allocation5 + $0x70] sm:$0xff]  ;;  %v925_v57 = vld [vmem:[#allocation5 + $0x68] sm:$0xff]  ;;  %s2043_s30 = scalar_lea.hbm %s2767_s13, 2 }
  0x28   : > { %v485_v0 = vld [vmem:[%s2792_s2 + $0x18] sm:$0xff]  ;;  %v484_v1 = vld [vmem:[%s2792_s2 + $0x10] sm:$0xff]  ;;  %v483_v2 = vld [vmem:[%s2792_s2 + $0x8] sm:$0xff]  ;;  %646 = vst.msk [vmem:[#allocation2 + $0x8] sm:$0x3] %vm645_vm2, %v2780_v44  ;;  %737 = vmatpush.msra.mxu2 %v696_v45 }
  0x29   : > { %527 = vmatpush.msra.mxu0 %v485_v0  ;;  %s473_s19 = scalar_lea.vmem %s2793_s1, %s1917_s28  ;;  %v482_v3 = vld [vmem:[%s2792_s2] sm:$0xff]  ;;  %649 = vst.msk [vmem:[#allocation2 + $0x20] sm:$0xff] %vm490_vm0, %v2780_v44  ;;  %802 = vmatpush.msra.mxu3 %v683_v46  ;;  %v1013_v63 = vld [vmem:[#allocation5 + $0x98] sm:$0xff]  ;;  %v1012_v12 = vld [vmem:[#allocation5 + $0x90] sm:$0xff]  ;;  %s2700_s28 = sand.u32 1, %s2115_s18  }
  0x2a   : > { %v474_v4 = vld [vmem:[%s473_s19] sm:$0xff]  ;;  %v475_v5 = vld [vmem:[%s473_s19 + $0x8] sm:$0xff]  ;;  %v476_v6 = vld [vmem:[%s473_s19 + $0x10] sm:$0xff]  ;;  %650 = vst.msk [vmem:[#allocation2 + $0x28] sm:$0x3] %vm645_vm2, %v2780_v44  ;;  %879 = vmatpush.msrb.mxu1 %v840_v47  ;;  %738 = vmatpush.msra.mxu2 %v695_v48  ;;  %s462_s21 = scalar_lea.vmem [#allocation8], %s2700_s28 }
  0x2b   : > { %528 = vmatpush.msra.mxu0 %v484_v1  ;;  %v477_v7 = vld [vmem:[%s473_s19 + $0x18] sm:$0xff]  ;;  %v478_v8 = vld [vmem:[%s473_s19 + $0x20] sm:$0xff]  ;;  %v479_v9 = vld [vmem:[%s473_s19 + $0x28] sm:$0xff]  ;;  %651 = vst.msk [vmem:[#allocation2 + $0x30] sm:$0xff] %vm490_vm0, %v2780_v44  ;;  %803 = vmatpush.msra.mxu3 %v682_v49  ;;  %s1689_s23 = sshll.u32 %s462_s21, 4  ;;  %s1675_s6 = scalar_lea.sflag [#allocation7], %s2700_s28  ;;  %s1690_s23 = int_to_ptr.vmem [resolvable:$true] %s1689_s23 }
  0x2c   : > { %v480_v10 = vld [vmem:[%s473_s19 + $0x30] sm:$0xff]  ;;  %v481_v11 = vld [vmem:[%s473_s19 + $0x38] sm:$0xff]  ;;  %v1977_v14 = vld [vmem:[%s2794_s3] ss:$0 sm:$0xff]  ;;  %652 = vst.msk [vmem:[#allocation2 + $0x38] sm:$0x3] %vm645_vm2, %v2780_v44  ;;  %880 = vmatpush.msrb.mxu1 %v839_v50  ;;  %1050 = vmatpush.msrb.mxu2 %v1013_v63 }
  0x2d   : > { %529 = vmatpush.msra.mxu0 %v483_v2  ;;  %653 = vst.msk [vmem:[#allocation2 + $0x40] sm:$0xff] %vm490_vm0, %v2780_v44  ;;  %v838_v51 = vld [vmem:[#allocation5 + $0x40] sm:$0xff]  ;;  %v1099_v27 = vld [vmem:[#allocation5 + $0xb8] sm:$0xff]  ;;  %v1098_v29 = vld [vmem:[#allocation5 + $0xb0] sm:$0xff]  ;;  %s1593_s19 = sld [smem:[#allocation4 + %s2229_s0]] }
  0x2e   : > { %654 = vst.msk [vmem:[#allocation2 + $0x48] sm:$0x3] %vm645_vm2, %v2780_v44  ;;  %v674_v52 = vld [vmem:[#allocation2] sm:$0xff]  ;;  %881 = vmatpush.msrb.mxu1 %v838_v51  ;;  %1051 = vmatpush.msrb.mxu2 %v1012_v12  ;;  %v1186_v28 = vld [vmem:[#allocation5 + $0xd8] sm:$0xff]  ;;  %v1185_v30 = vld [vmem:[#allocation5 + $0xd0] sm:$0xff] }
  0x2f   : > { %530 = vmatpush.msra.mxu0 %v482_v3  ;;  %655 = vst.msk [vmem:[#allocation2 + $0x50] sm:$0xff] %vm490_vm0, %v2780_v44  ;;  %v686_v53 = vld [vmem:[#allocation2 + $0x1] sm:$0xff]  ;;  %1831 = vmatmul.msk.f32.vlgmr.msra.gmra.mxu3 %vm490_vm0, %v674_v52  ;;  %v2394_v59 = vld [vmem:[%s2759_s5] ss:$0 sm:$0xff]  ;;  %v1272_v52 = vld [vmem:[#allocation5 + $0xf8] sm:$0xff] }
  0x30   : > { %1807 = vmatmul.msk.f32.vlgmr.msra.gmra.mxu0 %vm490_vm0, %v474_v4  ;;  %v829_v54 = vld [vmem:[#allocation2 + $0x2] sm:$0xff]  ;;  %656 = vst.msk [vmem:[#allocation2 + $0x58] sm:$0x3] %vm645_vm2, %v2780_v44  ;;  %1823 = vmatmul.msk.f32.vlgmr.msra.gmra.mxu2 %vm490_vm0, %v686_v53  ;;  %v1271_v53 = vld [vmem:[#allocation5 + $0xf0] sm:$0xff] }
  0x31   : > { %657 = vst.msk [vmem:[#allocation2 + $0x60] sm:$0xff] %vm490_vm0, %v2780_v44  ;;  %964 = vmatpush.msrb.mxu0 %v927_v55  ;;  %v924_v58 = vld [vmem:[#allocation5 + $0x60] sm:$0xff]  ;;  %1136 = vmatpush.msrb.mxu3 %v1099_v27  ;;  %v1011_v31 = vld [vmem:[#allocation5 + $0x88] sm:$0xff] }
  0x32   : > { %658 = vst.msk [vmem:[#allocation2 + $0x68] sm:$0x3] %vm645_vm2, %v2780_v44  ;;  %1052 = vmatpush.msrb.mxu2 %v1011_v31  ;;  %v1096_v47 = vld [vmem:[#allocation5 + $0xa0] sm:$0xff] }
  0x33   : > { %659 = vst.msk [vmem:[#allocation2 + $0x70] sm:$0xff] %vm490_vm0, %v2780_v44  ;;  %965 = vmatpush.msrb.mxu0 %v926_v56  ;;  %1137 = vmatpush.msrb.mxu3 %v1098_v29  ;;  %v1183_v48 = vld [vmem:[#allocation5 + $0xc0] sm:$0xff]  ;;  %v1270_v56 = vld [vmem:[#allocation5 + $0xe8] sm:$0xff] }
  0x34   : > { %660 = vst.msk [vmem:[#allocation2 + $0x78] sm:$0x3] %vm645_vm2, %v2780_v44 }
  0x35   : > { %661 = vst.msk [vmem:[#allocation2 + $0x80] sm:$0xff] %vm490_vm0, %v2780_v44  ;;  %966 = vmatpush.msrb.mxu0 %v925_v57 }
  0x36   : > { %662 = vst.msk [vmem:[#allocation2 + $0x88] sm:$0x3] %vm645_vm2, %v2780_v44 }
  0x37   : > { %663 = vst.msk [vmem:[#allocation2 + $0x90] sm:$0xff] %vm490_vm0, %v2780_v44  ;;  %967 = vmatpush.msrb.mxu0 %v924_v58  ;;  %v1269_v58 = vld [vmem:[#allocation5 + $0xe0] sm:$0xff] }
  0x38   : > { %1808 = vmatmul.msk.f32.gmra.mxu0 %vm490_vm0, %v475_v5  ;;  %664 = vst.msk [vmem:[#allocation2 + $0x98] sm:$0x3] %vm645_vm2, %v2780_v44 }
  0x39   : > { %1309 = vmatpush.msra.mxu0 %v1272_v52 }
  0x3b   : > { %1310 = vmatpush.msra.mxu0 %v1271_v53 }
  0x3d   : > { %1311 = vmatpush.msra.mxu0 %v1270_v56 }
  0x3f   : > { %1312 = vmatpush.msra.mxu0 %v1269_v58 }
  0x40   : > { %1809 = vmatmul.msk.f32.gmra.mxu0 %vm490_vm0, %v476_v6 }
  0x48   : > { %1810 = vmatmul.msk.f32.gmra.mxu0 %vm490_vm0, %v477_v7 }
  0x50   : > { %1811 = vmatmul.msk.f32.gmra.mxu0 %vm490_vm0, %v478_v8 }
  0x58   : > { %1812 = vmatmul.msk.f32.gmra.mxu0 %vm490_vm0, %v479_v9 }
  0x60   : > { %1813 = vmatmul.msk.f32.gmra.mxu0 %vm490_vm0, %v480_v10 }
  0x68   : > { %1814 = vmatmul.msk.f32.gmra.mxu0 %vm490_vm0, %v481_v11 }
  0xad   : > { %v532_v15 = vpop.f32.mrf.mxu0 }
  0xae   : > { %v2300_v16 = vadd.f32 %v1977_v14, %v532_v15 }
  0xb0   : > { %v2778_v17 = vmax.f32 %v2300_v16, 0.0 }
  0xb2   : > { %1815 = vmatmul.msk.f32.vlgmr.msra.gmra.mxu1 %vm570_vm1, %v2778_v17 }
  0xb3   : > { %1223 = vmatpush.msra.mxu1 %v1186_v28  ;;  %v1267_v28 = vld [vmem:[#allocation2 + $0x91] sm:$0xff]  ;;  %v740_v29 = vpop.f32.mrf.mxu2 }
  0xb5   : > { %v535_v18 = vpop.f32.mrf.mxu0  ;;  %1224 = vmatpush.msra.mxu1 %v1185_v30 }
  0xb6   : > { %v2306_v19 = vadd.f32 %v1977_v14, %v535_v18 }
  0xb8   : > { %v2779_v20 = vmax.f32 %v2306_v19, 0.0 }
  0xba   : > { %1816 = vmatmul.msk.f32.gmra.mxu1 %vm570_vm1, %v2779_v20 }
  0xbd   : > { %v538_v21 = vpop.f32.mrf.mxu0 }
  0xbe   : > { %v2312_v22 = vadd.f32 %v1977_v14, %v538_v21 }
  0xc0   : > { %v2777_v23 = vmax.f32 %v2312_v22, 0.0 }
  0xc2   : > { %1817 = vmatmul.msk.f32.gmra.mxu1 %vm570_vm1, %v2777_v23 }
  0xc5   : > { %v541_v24 = vpop.f32.mrf.mxu0 }
  0xc6   : > { %v2318_v25 = vadd.f32 %v1977_v14, %v541_v24 }
  0xc8   : > { %v2776_v26 = vmax.f32 %v2318_v25, 0.0 }
  0xca   : > { %1818 = vmatmul.msk.f32.gmra.mxu1 %vm570_vm1, %v2776_v26 }
  0xcd   : > { %v544_v32 = vpop.f32.mrf.mxu0 }
  0xce   : > { %v2324_v33 = vadd.f32 %v1977_v14, %v544_v32 }
  0xd0   : > { %v2775_v34 = vmax.f32 %v2324_v33, 0.0 }
  0xd2   : > { %1819 = vmatmul.msk.f32.gmra.mxu1 %vm570_vm1, %v2775_v34 }
  0xd5   : > { %v547_v35 = vpop.f32.mrf.mxu0 }
  0xd6   : > { %v2330_v36 = vadd.f32 %v1977_v14, %v547_v35  ;;  %v1097_v35 = vld [vmem:[#allocation5 + $0xa8] sm:$0xff] }
  0xd7   : > { %1138 = vmatpush.msrb.mxu3 %v1097_v35  ;;  %v805_v35 = vpop.f32.mrf.mxu3 }
  0xd8   : > { %v2774_v37 = vmax.f32 %v2330_v36, 0.0 }
  0xd9   : > { %1139 = vmatpush.msrb.mxu3 %v1096_v47 }
  0xda   : > { %1820 = vmatmul.msk.f32.gmra.mxu1 %vm570_vm1, %v2774_v37 }
  0xdd   : > { %v550_v38 = vpop.f32.mrf.mxu0 }
  0xde   : > { %v2336_v39 = vadd.f32 %v1977_v14, %v550_v38  ;;  %v1184_v38 = vld [vmem:[#allocation5 + $0xc8] sm:$0xff] }
  0xdf   : > { %1225 = vmatpush.msra.mxu1 %v1184_v38 }
  0xe0   : > { %v2773_v40 = vmax.f32 %v2336_v39, 0.0 }
  0xe1   : > { %1226 = vmatpush.msra.mxu1 %v1183_v48 }
  0xe2   : > { %1821 = vmatmul.msk.f32.gmra.mxu1 %vm570_vm1, %v2773_v40 }
  0xe5   : > { %v553_v41 = vpop.f32.mrf.mxu0 }
  0xe6   : > { %v2342_v42 = vadd.f32 %v1977_v14, %v553_v41  ;;  %v1010_v41 = vld [vmem:[#allocation5 + $0x80] sm:$0xff] }
  0xe7   : > { %1053 = vmatpush.msrb.mxu2 %v1010_v41 }
  0xe8   : > { %2795 = vst [vmem:[#allocation18_spill] sm:$0xff] %v2342_v42  ;;  %v2772_v43 = vmax.f32 %v2342_v42, 0.0 }
  0xea   : > { %1822 = vmatmul.msk.f32.gmra.mxu1 %vm570_vm1, %v2772_v43 }
  0xf2   : > { %1839 = vmatmul.msk.f32.vlgmr.msrb.gmra.mxu1 %vm490_vm0, %v829_v54 }
 0x12f   : > { %v612_v60 = vpop.f32.mrf.mxu1 }
 0x130   : > { %v613_v61 = vadd.f32 %v2394_v59, %v612_v60 }
 0x132   : > { %v636_v62 = vmax.f32 %v613_v61, 0.0 }
 0x134   : > { %666 = vst.msk [vmem:[#allocation2 + $0x11] sm:$0xff] %vm490_vm0, %v636_v62 }
 0x137   : > { %v615_v0 = vpop.f32.mrf.mxu1 }
 0x138   : > { %v616_v1 = vadd.f32 %v2394_v59, %v615_v0 }
 0x13a   : > { %v637_v2 = vmax.f32 %v616_v1, 0.0 }
 0x13b   : > { %v2399_v3 = vld [vmem:[#allocation2 + $0x11] sm:$0xff] }
 0x13c   : > { %v675_v4 = vld [vmem:[#allocation2 + $0x10] sm:$0xff]  ;;  %667 = vst.msk [vmem:[#allocation2 + $0x21] sm:$0xff] %vm490_vm0, %v637_v2  ;;  %1824 = vmatmul.msk.f32.gmra.mxu2 %vm490_vm0, %v2399_v3 }
 0x13d   : > { %v2401_v5 = vld [vmem:[#allocation2 + $0x12] sm:$0xff]  ;;  %1832 = vmatmul.msk.f32.gmra.mxu3 %vm490_vm0, %v675_v4  ;;  %1847 = vmatmul.msk.f32.vlgmr.msrb.gmra.mxu0 %vm490_vm0, %v675_v4 }
 0x13e   : > { %1840 = vmatmul.msk.f32.gmra.mxu1 %vm490_vm0, %v2401_v5 }
 0x13f   : > { %v618_v6 = vpop.f32.mrf.mxu1 }
 0x140   : > { %v619_v7 = vadd.f32 %v2394_v59, %v618_v6 }
 0x142   : > { %v638_v8 = vmax.f32 %v619_v7, 0.0 }
 0x143   : > { %v2411_v9 = vld [vmem:[#allocation2 + $0x21] sm:$0xff] }
 0x144   : > { %v2413_v10 = vld [vmem:[#allocation2 + $0x20] sm:$0xff]  ;;  %668 = vst.msk [vmem:[#allocation2 + $0x31] sm:$0xff] %vm490_vm0, %v638_v8  ;;  %1825 = vmatmul.msk.f32.gmra.mxu2 %vm490_vm0, %v2411_v9 }
 0x145   : > { %v2415_v11 = vld [vmem:[#allocation2 + $0x22] sm:$0xff]  ;;  %1833 = vmatmul.msk.f32.gmra.mxu3 %vm490_vm0, %v2413_v10  ;;  %1848 = vmatmul.msk.f32.gmra.mxu0 %vm490_vm0, %v2413_v10 }
 0x146   : > { %1841 = vmatmul.msk.f32.gmra.mxu1 %vm490_vm0, %v2415_v11 }
 0x147   : > { %v621_v13 = vpop.f32.mrf.mxu1 }
 0x148   : > { %v622_v14 = vadd.f32 %v2394_v59, %v621_v13 }
 0x14a   : > { %v639_v15 = vmax.f32 %v622_v14, 0.0 }
 0x14b   : > { %v2427_v18 = vld [vmem:[#allocation2 + $0x31] sm:$0xff] }
 0x14c   : > { %v2429_v21 = vld [vmem:[#allocation2 + $0x30] sm:$0xff]  ;;  %669 = vst.msk [vmem:[#allocation2 + $0x41] sm:$0xff] %vm490_vm0, %v639_v15  ;;  %1826 = vmatmul.msk.f32.gmra.mxu2 %vm490_vm0, %v2427_v18 }
 0x14d   : > { %v2431_v24 = vld [vmem:[#allocation2 + $0x32] sm:$0xff]  ;;  %1834 = vmatmul.msk.f32.gmra.mxu3 %vm490_vm0, %v2429_v21  ;;  %1849 = vmatmul.msk.f32.gmra.mxu0 %vm490_vm0, %v2429_v21 }
 0x14e   : > { %1842 = vmatmul.msk.f32.gmra.mxu1 %vm490_vm0, %v2431_v24 }
 0x14f   : > { %v624_v32 = vpop.f32.mrf.mxu1 }
 0x150   : > { %v625_v45 = vadd.f32 %v2394_v59, %v624_v32 }
 0x152   : > { %v640_v46 = vmax.f32 %v625_v45, 0.0 }
 0x153   : > { %v2443_v49 = vld [vmem:[#allocation2 + $0x41] sm:$0xff] }
 0x154   : > { %v2445_v50 = vld [vmem:[#allocation2 + $0x40] sm:$0xff]  ;;  %670 = vst.msk [vmem:[#allocation2 + $0x51] sm:$0xff] %vm490_vm0, %v640_v46  ;;  %1827 = vmatmul.msk.f32.gmra.mxu2 %vm490_vm0, %v2443_v49 }
 0x155   : > { %v2447_v51 = vld [vmem:[#allocation2 + $0x42] sm:$0xff]  ;;  %1835 = vmatmul.msk.f32.gmra.mxu3 %vm490_vm0, %v2445_v50  ;;  %1850 = vmatmul.msk.f32.gmra.mxu0 %vm490_vm0, %v2445_v50 }
 0x156   : > { %1843 = vmatmul.msk.f32.gmra.mxu1 %vm490_vm0, %v2447_v51 }
 0x157   : > { %v627_v54 = vpop.f32.mrf.mxu1 }
 0x158   : > { %v628_v55 = vadd.f32 %v2394_v59, %v627_v54 }
 0x15a   : > { %v641_v57 = vmax.f32 %v628_v55, 0.0 }
 0x15b   : > { %v691_v60 = vld [vmem:[#allocation2 + $0x51] sm:$0xff] }
 0x15c   : > { %v679_v61 = vld [vmem:[#allocation2 + $0x50] sm:$0xff]  ;;  %671 = vst.msk [vmem:[#allocation2 + $0x61] sm:$0xff] %vm490_vm0, %v641_v57  ;;  %1828 = vmatmul.msk.f32.gmra.mxu2 %vm490_vm0, %v691_v60 }
 0x15d   : > { %v2459_v62 = vld [vmem:[#allocation2 + $0x52] sm:$0xff]  ;;  %1836 = vmatmul.msk.f32.gmra.mxu3 %vm490_vm0, %v679_v61  ;;  %1851 = vmatmul.msk.f32.gmra.mxu0 %vm490_vm0, %v679_v61 }
 0x15e   : > { %1844 = vmatmul.msk.f32.gmra.mxu1 %vm490_vm0, %v2459_v62 }
 0x15f   : > { %v630_v63 = vpop.f32.mrf.mxu1 }
 0x160   : > { %v631_v0 = vadd.f32 %v2394_v59, %v630_v63 }
 0x162   : > { %v642_v1 = vmax.f32 %v631_v0, 0.0  ;;  %v1455_v0 = vld [vmem:[%s2762_s8 + $0x18] sm:$0xff] }
 0x163   : > { %v692_v2 = vld [vmem:[#allocation2 + $0x61] sm:$0xff]  ;;  %1496 = vmatpush.msra.mxu3 %v1455_v0 }
 0x164   : > { %v680_v4 = vld [vmem:[#allocation2 + $0x60] sm:$0xff]  ;;  %672 = vst.msk [vmem:[#allocation2 + $0x71] sm:$0xff] %vm490_vm0, %v642_v1  ;;  %1829 = vmatmul.msk.f32.gmra.mxu2 %vm490_vm0, %v692_v2 }
 0x165   : > { %v2468_v6 = vld [vmem:[#allocation2 + $0x62] sm:$0xff]  ;;  %1837 = vmatmul.msk.f32.gmra.mxu3 %vm490_vm0, %v680_v4  ;;  %1852 = vmatmul.msk.f32.gmra.mxu0 %vm490_vm0, %v680_v4 }
 0x166   : > { %1845 = vmatmul.msk.f32.gmra.mxu1 %vm490_vm0, %v2468_v6 }
 0x167   : > { %v633_v7 = vpop.f32.mrf.mxu1 }
 0x168   : > { %v634_v8 = vadd.f32 %v2394_v59, %v633_v7  ;;  %v1358_v59 = vld [vmem:[#allocation5 + $0x118] sm:$0xff] }
 0x169   : > { %1395 = vmatpush.msra.mxu2 %v1358_v59  ;;  %v1453_v59 = vld [vmem:[%s2762_s8 + $0x8] sm:$0xff] }
 0x16a   : > { %v643_v12 = vmax.f32 %v634_v8, 0.0 }
 0x16b   : > { %v693_v13 = vld [vmem:[#allocation2 + $0x71] sm:$0xff] }
 0x16c   : > { %v681_v14 = vld [vmem:[#allocation2 + $0x70] sm:$0xff]  ;;  %673 = vst.msk [vmem:[#allocation2 + $0x81] sm:$0xff] %vm490_vm0, %v643_v12  ;;  %1830 = vmatmul.msk.f32.gmra.mxu2 %vm490_vm0, %v693_v13 }
 0x16d   : > { %v2477_v15 = vld [vmem:[#allocation2 + $0x72] sm:$0xff]  ;;  %1838 = vmatmul.msk.f32.gmra.mxu3 %vm490_vm0, %v681_v14  ;;  %1853 = vmatmul.msk.f32.gmra.mxu0 %vm490_vm0, %v681_v14 }
 0x16e   : > { %1846 = vmatmul.msk.f32.gmra.mxu1 %vm490_vm0, %v2477_v15  ;;  %v1454_v12 = vld [vmem:[%s2762_s8 + $0x10] sm:$0xff] }
 0x16f   : > { %1497 = vmatpush.msra.mxu3 %v1454_v12 }
 0x171   : > { %1498 = vmatpush.msra.mxu3 %v1453_v59 }
 0x173   : > { %v922_v27 = vld [vmem:[#allocation2 + $0x80] sm:$0xff] }
 0x174   : > { %1855 = vmatmul.msk.f32.vlgmr.msrb.gmra.mxu2 %vm490_vm0, %v2399_v3  ;;  %v1357_v3 = vld [vmem:[#allocation5 + $0x110] sm:$0xff] }
 0x175   : > { %1863 = vmatmul.msk.f32.vlgmr.msrb.gmra.mxu3 %vm490_vm0, %v2401_v5  ;;  %1854 = vmatmul.msk.f32.gmra.mxu0 %vm490_vm0, %v922_v27  ;;  %v1356_v5 = vld [vmem:[#allocation5 + $0x108] sm:$0xff] }
 0x176   : > { %1871 = vmatmul.msk.f32.vlgmr.msra.gmra.mxu1 %vm490_vm0, %v2413_v10  ;;  %1396 = vmatpush.msra.mxu2 %v1357_v3  ;;  %v1008_v10 = vld [vmem:[#allocation2 + $0x81] sm:$0xff] }
 0x177   : > { %v1452_v3 = vld [vmem:[%s2762_s8] sm:$0xff] }
 0x178   : > { %1397 = vmatpush.msra.mxu2 %v1356_v5  ;;  %1499 = vmatpush.msra.mxu3 %v1452_v3 }
 0x17c   : > { %1856 = vmatmul.msk.f32.gmra.mxu2 %vm490_vm0, %v2411_v9 }
 0x17d   : > { %1864 = vmatmul.msk.f32.gmra.mxu3 %vm490_vm0, %v2415_v11  ;;  %1879 = vmatmul.msk.f32.vlgmr.msra.gmra.mxu0 %vm490_vm0, %v2411_v9  ;;  %v1355_v9 = vld [vmem:[#allocation5 + $0x100] sm:$0xff] }
 0x17e   : > { %1872 = vmatmul.msk.f32.gmra.mxu1 %vm490_vm0, %v2429_v21  ;;  %1398 = vmatpush.msra.mxu2 %v1355_v9  ;;  %v1181_v21 = vld [vmem:[#allocation2 + $0x90] sm:$0xff] }
 0x184   : > { %1857 = vmatmul.msk.f32.gmra.mxu2 %vm490_vm0, %v2427_v18 }
 0x185   : > { %1865 = vmatmul.msk.f32.gmra.mxu3 %vm490_vm0, %v2431_v24  ;;  %1880 = vmatmul.msk.f32.gmra.mxu0 %vm490_vm0, %v2427_v18  ;;  %v1094_v18 = vld [vmem:[#allocation2 + $0x82] sm:$0xff] }
 0x186   : > { %1873 = vmatmul.msk.f32.gmra.mxu1 %vm490_vm0, %v2445_v50 }
 0x18c   : > { %1858 = vmatmul.msk.f32.gmra.mxu2 %vm490_vm0, %v2443_v49 }
 0x18d   : > { %1866 = vmatmul.msk.f32.gmra.mxu3 %vm490_vm0, %v2447_v51  ;;  %1881 = vmatmul.msk.f32.gmra.mxu0 %vm490_vm0, %v2443_v49 }
 0x18e   : > { %1874 = vmatmul.msk.f32.gmra.mxu1 %vm490_vm0, %v679_v61 }
 0x194   : > { %1859 = vmatmul.msk.f32.gmra.mxu2 %vm490_vm0, %v691_v60 }
 0x195   : > { %1867 = vmatmul.msk.f32.gmra.mxu3 %vm490_vm0, %v2459_v62  ;;  %1882 = vmatmul.msk.f32.gmra.mxu0 %vm490_vm0, %v691_v60 }
 0x196   : > { %1875 = vmatmul.msk.f32.gmra.mxu1 %vm490_vm0, %v680_v4 }
 0x19c   : > { %1860 = vmatmul.msk.f32.gmra.mxu2 %vm490_vm0, %v692_v2 }
 0x19d   : > { %1868 = vmatmul.msk.f32.gmra.mxu3 %vm490_vm0, %v2468_v6  ;;  %1883 = vmatmul.msk.f32.gmra.mxu0 %vm490_vm0, %v692_v2 }
 0x19e   : > { %1876 = vmatmul.msk.f32.gmra.mxu1 %vm490_vm0, %v681_v14 }
 0x1a4   : > { %1861 = vmatmul.msk.f32.gmra.mxu2 %vm490_vm0, %v693_v13 }
 0x1a5   : > { %1869 = vmatmul.msk.f32.gmra.mxu3 %vm490_vm0, %v2477_v15  ;;  %1884 = vmatmul.msk.f32.gmra.mxu0 %vm490_vm0, %v693_v13 }
 0x1a6   : > { %1877 = vmatmul.msk.f32.gmra.mxu1 %vm490_vm0, %v922_v27 }
 0x1ac   : > { %1862 = vmatmul.msk.f32.gmra.mxu2 %vm490_vm0, %v1008_v10 }
 0x1ad   : > { %1870 = vmatmul.msk.f32.gmra.mxu3 %vm490_vm0, %v1094_v18  ;;  %1885 = vmatmul.msk.f32.gmra.mxu0 %vm490_vm0, %v1008_v10 }
 0x1ae   : > { %1878 = vmatmul.msk.f32.gmra.mxu1 %vm490_vm0, %v1181_v21 }
 0x1b4   : > { %1887 = vmatmul.msk.f32.vlgmr.msra.gmra.mxu2 %vm490_vm0, %v2415_v11  ;;  %v883_v11 = vpop.f32.mrf.mxu1 }
 0x1b5   : > { %1886 = vmatmul.msk.f32.gmra.mxu0 %vm490_vm0, %v1267_v28 }
 0x1ba   : > { %v969_v38 = vpop.f32.mrf.mxu0 }
 0x1bc   : > { %1888 = vmatmul.msk.f32.gmra.mxu2 %vm490_vm0, %v2431_v24  ;;  %v886_v45 = vpop.f32.mrf.mxu1 }
 0x1bf   : > { %v743_v30 = vpop.f32.mrf.mxu2 }
 0x1c0   : > { %v808_v24 = vpop.f32.mrf.mxu3 }
 0x1c1   : > { %v809_v43 = vadd.f32 %v808_v24, %v743_v30  ;;  %v2611_v30 = vld [vmem:[%s2761_s7] ss:$0 sm:$0xff] }
 0x1c2   : > { %v972_v47 = vpop.f32.mrf.mxu0 }
 0x1c3   : > { %v908_v37 = vadd.f32 %v886_v45, %v809_v43 }
 0x1c4   : > { %1889 = vmatmul.msk.f32.gmra.mxu2 %vm490_vm0, %v2447_v51  ;;  %v889_v50 = vpop.f32.mrf.mxu1  ;;  %v1353_v51 = vld [vmem:[#allocation2 + $0x92] sm:$0xff] }
 0x1c5   : > { %v994_v17 = vadd.f32 %v972_v47, %v908_v37 }
 0x1c7   : > { %v2541_v31 = vpop.f32.mrf.mxu2 }
 0x1c8   : > { %v811_v48 = vpop.f32.mrf.mxu3 }
 0x1c9   : > { %v812_v3 = vadd.f32 %v811_v48, %v2541_v31 }
 0x1ca   : > { %v975_v52 = vpop.f32.mrf.mxu0 }
 0x1cc   : > { %1890 = vmatmul.msk.f32.gmra.mxu2 %vm490_vm0, %v2459_v62  ;;  %v892_v55 = vpop.f32.mrf.mxu1 }
 0x1cf   : > { %v2545_v32 = vpop.f32.mrf.mxu2 }
 0x1d0   : > { %v814_v53 = vpop.f32.mrf.mxu3 }
 0x1d1   : > { %v815_v24 = vadd.f32 %v814_v53, %v2545_v32 }
 0x1d2   : > { %v2561_v56 = vpop.f32.mrf.mxu0 }
 0x1d3   : > { %v910_v48 = vadd.f32 %v892_v55, %v815_v24 }
 0x1d4   : > { %1891 = vmatmul.msk.f32.gmra.mxu2 %vm490_vm0, %v2468_v6  ;;  %v2565_v60 = vpop.f32.mrf.mxu1 }
 0x1d7   : > { %v2549_v41 = vpop.f32.mrf.mxu2 }
 0x1d8   : > { %v2563_v57 = vpop.f32.mrf.mxu3 }
 0x1d9   : > { %v818_v32 = vadd.f32 %v2563_v57, %v2549_v41 }
 0x1da   : > { %v2567_v61 = vpop.f32.mrf.mxu0 }
 0x1db   : > { %v911_v55 = vadd.f32 %v2565_v60, %v818_v32 }
 0x1dc   : > { %1892 = vmatmul.msk.f32.gmra.mxu2 %vm490_vm0, %v2477_v15  ;;  %v2574_v1 = vpop.f32.mrf.mxu1 }
 0x1df   : > { %v2553_v46 = vpop.f32.mrf.mxu2 }
 0x1e0   : > { %v2569_v63 = vpop.f32.mrf.mxu3 }
 0x1e1   : > { %v821_v41 = vadd.f32 %v2569_v63, %v2553_v46 }
 0x1e2   : > { %v2576_v4 = vpop.f32.mrf.mxu0 }
 0x1e4   : > { %1893 = vmatmul.msk.f32.gmra.mxu2 %vm490_vm0, %v1094_v18  ;;  %v2580_v8 = vpop.f32.mrf.mxu1  ;;  %v806_v18 = vadd.f32 %v805_v35, %v740_v29 }
 0x1e6   : > { %v907_v21 = vadd.f32 %v883_v11, %v806_v18  ;;  %v909_v11 = vadd.f32 %v889_v50, %v812_v3 }
 0x1e7   : > { %v2556_v49 = vpop.f32.mrf.mxu2 }
 0x1e8   : > { %v2578_v6 = vpop.f32.mrf.mxu3  ;;  %v993_v12 = vadd.f32 %v969_v38, %v907_v21  ;;  %v995_v38 = vadd.f32 %v975_v52, %v909_v11 }
 0x1e9   : > { %v824_v46 = vadd.f32 %v2578_v6, %v2556_v49 }
 0x1ea   : > { %v2585_v13 = vpop.f32.mrf.mxu0 }
 0x1ec   : > { %1894 = vmatmul.msk.f32.gmra.mxu2 %vm490_vm0, %v1353_v51  ;;  %v2591_v27 = vpop.f32.mrf.mxu1 }
 0x1ef   : > { %v2559_v54 = vpop.f32.mrf.mxu2 }
 0x1f0   : > { %v2587_v14 = vpop.f32.mrf.mxu3 }
 0x1f2   : > { %v2599_v5 = vpop.f32.mrf.mxu0 }
 0x1f4   : > { %v1228_v28 = vpop.f32.mrf.mxu1 }
 0x1f7   : > { %v1055_v58 = vpop.f32.mrf.mxu2 }
 0x1f8   : > { %v1141_v9 = vpop.f32.mrf.mxu3  ;;  %v1079_v59 = vadd.f32 %v1055_v58, %v993_v12 }
 0x1fa   : > { %v1314_v51 = vpop.f32.mrf.mxu0  ;;  %v1165_v34 = vadd.f32 %v1141_v9, %v1079_v59  ;;  %v996_v9 = vadd.f32 %v2561_v56, %v910_v48  ;;  %v997_v59 = vadd.f32 %v2567_v61, %v911_v55  ;;  %v1591_v48 = vlaneseq }
 0x1fc   : > { %v1231_v26 = vpop.f32.mrf.mxu1  ;;  %v1252_v44 = vadd.f32 %v1228_v28, %v1165_v34 }
 0x1fe   : > { %v1338_v18 = vadd.f32 %v1314_v51, %v1252_v44 }
 0x1ff   : > { %v1058_v62 = vpop.f32.mrf.mxu2 }
 0x200   : > { %v1144_v40 = vpop.f32.mrf.mxu3  ;;  %v1080_v29 = vadd.f32 %v1058_v62, %v994_v17 }
 0x202   : > { %v1317_v20 = vpop.f32.mrf.mxu0  ;;  %v1166_v42 = vadd.f32 %v1144_v40, %v1080_v29  ;;  %v912_v29 = vadd.f32 %v2574_v1, %v821_v41 }
 0x204   : > { %v1234_v37 = vpop.f32.mrf.mxu1  ;;  %v1253_v47 = vadd.f32 %v1231_v26, %v1166_v42  ;;  %v998_v61 = vadd.f32 %v2576_v4, %v912_v29  ;;  %v1598_v4 = vld [vmem:[%s2765_s11] sm:$0xff] }
 0x205   : > { %1618 = vmatpush.msrb.mxu0 %v1598_v4  ;;  %v2798_v4 = vmax.f32 %v2300_v16, 0.0 }
 0x206   : > { %v1339_v40 = vadd.f32 %v1317_v20, %v1253_v47  ;;  %v913_v47 = vadd.f32 %v2580_v8, %v824_v46 }
 0x207   : > { %v1061_v2 = vpop.f32.mrf.mxu2 }
 0x208   : > { %v1147_v35 = vpop.f32.mrf.mxu3  ;;  %v1081_v31 = vadd.f32 %v1061_v2, %v995_v38 }
 0x20a   : > { %v1320_v17 = vpop.f32.mrf.mxu0  ;;  %v1167_v58 = vadd.f32 %v1147_v35, %v1081_v31 }
 0x20c   : > { %v1254_v53 = vadd.f32 %v1234_v37, %v1167_v58  ;;  %v1237_v2 = vpop.f32.mrf.mxu1 }
 0x20e   : > { %v1340_v20 = vadd.f32 %v1320_v17, %v1254_v53  ;;  %v2796_v53 = vmov 0.0  }
 0x20f   : > { %v1064_v7 = vpop.f32.mrf.mxu2 }
 0x210   : > { %v1150_v44 = vpop.f32.mrf.mxu3  ;;  %v1082_v26 = vadd.f32 %v1064_v7, %v996_v9 }
 0x212   : > { %v1323_v28 = vpop.f32.mrf.mxu0  ;;  %v1168_v51 = vadd.f32 %v1150_v44, %v1082_v26  ;;  %v827_v44 = vadd.f32 %v2587_v14, %v2559_v54 }
 0x214   : > { %v1255_v7 = vadd.f32 %v1237_v2, %v1168_v51  ;;  %v1240_v11 = vpop.f32.mrf.mxu1 }
 0x217   : > { %v2589_v15 = vpop.f32.mrf.mxu2 }
 0x218   : > { %v1153_v12 = vpop.f32.mrf.mxu3  ;;  %v1083_v3 = vadd.f32 %v2589_v15, %v997_v59 }
 0x21a   : > { %v1326_v38 = vpop.f32.mrf.mxu0 }
 0x21c   : > { %v1243_v49 = vpop.f32.mrf.mxu1 }
 0x21f   : > { %v2601_v10 = vpop.f32.mrf.mxu2 }
 0x220   : > { %v1156_v15 = vpop.f32.mrf.mxu3  ;;  %v1084_v37 = vadd.f32 %v2601_v10, %v998_v61  ;;  %v999_v10 = vadd.f32 %v2585_v13, %v913_v47 }
 0x222   : > { %v1170_v17 = vadd.f32 %v1156_v15, %v1084_v37  ;;  %v1329_v58 = vpop.f32.mrf.mxu0 }
 0x224   : > { %v1246_v54 = vpop.f32.mrf.mxu1 }
 0x227   : > { %v2603_v0 = vpop.f32.mrf.mxu2 }
 0x228   : > { %v1085_v9 = vadd.f32 %v2603_v0, %v999_v10 }
 0x22f   : > { %v2605_v23 = vpop.f32.mrf.mxu2 }
 0x237   : > { %v1400_v43 = vpop.f32.mrf.mxu2 }
 0x238   : > { %v1424_v45 = vadd.f32 %v1400_v43, %v1338_v18  ;;  %v1341_v18 = vadd.f32 %v1323_v28, %v1255_v7  ;;  %v1169_v43 = vadd.f32 %v1153_v12, %v1083_v3  ;;  %v1332_v12 = vpop.f32.mrf.mxu0 }
 0x23a   : > { %v1436_v34 = vadd.f32 %v2611_v30, %v1424_v45  ;;  %v1256_v45 = vadd.f32 %v1240_v11, %v1169_v43 }
 0x23c   : > { %v1444_v50 = vmax.f32 %v1436_v34, 0.0  ;;  %v1342_v34 = vadd.f32 %v1326_v38, %v1256_v45  ;;  %v1980_v45 = vld [vmem:[%s2763_s9] ss:$0 sm:$0xff] }
 0x23e   : > { %1895 = vmatmul.msk.f32.vlgmr.msra.gmra.mxu3 %vm490_vm0, %v1444_v50  ;;  %v1594_v50 = vstv %s1593_s19  ;;  %s1687_s19 = scalar_lea.hbm %s2767_s13, %s2229_s0 }
 0x23f   : > { %v1403_v62 = vpop.f32.mrf.mxu2  ;;  %s1691_s24 = sshll.u32 %s1687_s19, 4  ;;  %s1692_s24 = int_to_ptr.hbm [resolvable:$true] %s1691_s24 }
 0x240   : > { %v1425_v52 = vadd.f32 %v1403_v62, %v1339_v40  ;;  %v1592_v40 = vand.u32 127, %v1591_v48  ;;  %v1257_v62 = vadd.f32 %v1243_v49, %v1170_v17  ;;  %v2799_v49 = vmax.f32 %v2312_v22, 0.0  ;;  %s2037_s22 = sshra.s32 %s1692_s24, 4  ;;  %s2038_s22 = int_to_ptr.hbm [resolvable:$true] %s2037_s22 }
 0x241   : > { %v2801_v22 = vmax.f32 %v2324_v33, 0.0  ;;  %s2039_s25 = scalar_lea.hbm %s2038_s22, 1  ;;  %p2044_p3 = scmp.lt.s32.totalorder %s2038_s22, %s2767_s13 }
 0x242   : > { %v1437_v42 = vadd.f32 %v2611_v30, %v1425_v52  ;;  %vm1595_vm4 = vcmp.eq.s32.totalorder %v1592_v40, %v1594_v50  ;;  %v1159_v52 = vpop.f32.mrf.mxu3  ;;  %v1343_v13 = vadd.f32 %v1329_v58, %v1257_v62  ;;  %v1564_v58 = vld [vmem:[%s2764_s10 + $0x8] sm:$0xff]  ;;  %p2040_p0 = scmp.ne.s32.totalorder %s2038_s22, %s2039_s25  ;;  %p2045_p4 = scmp.lt.s32.totalorder %s2043_s30, %s2039_s25 }
 0x243   : > { %v1904_v26 = vsel %vm1595_vm4, 1.0, %v2796_v53  ;;  %v1171_v55 = vadd.f32 %v1159_v52, %v1085_v9  ;;  %1583 = vmatpush.msrb.mxu1 %v1564_v58  ;;  %v2802_v53 = vmax.f32 %v2330_v36, 0.0 }
 0x244   : > { %v1445_v21 = vmax.f32 %v1437_v42, 0.0  ;;  %v914_v42 = vadd.f32 %v2591_v27, %v827_v44  ;;  %1905 = vmatmul.msk.f32.vlgmr.msrb.gmra.mxu0 %vm1599_vm3, %v1904_v26  ;;  %v2800_v44 = vmax.f32 %v2318_v25, 0.0  ;;  %p2041_p1 = pnand %p2040_p0, %p2246_p5  ;;  %p2046_p7 = por %p2045_p4, %p2044_p3 }
 0x245   : > { %v1258_v0 = vadd.f32 %v1246_v54, %v1171_v55  ;;  %v2803_v54 = vmax.f32 %v2336_v39, 0.0 }
 0x246   : > { %1896 = vmatmul.msk.f32.gmra.mxu3 %vm490_vm0, %v1445_v21  ;;  %v1000_v21 = vadd.f32 %v2599_v5, %v914_v42  ;;  %v1335_v5 = vpop.f32.mrf.mxu0  ;;  %p2042_p2 = pneg %p2041_p1 }
 0x247   : > { %v1406_v56 = vpop.f32.mrf.mxu2  ;;  %v1344_v27 = vadd.f32 %v1332_v12, %v1258_v0 }
 0x248   : > { %v1426_v57 = vadd.f32 %v1406_v56, %v1340_v20  ;;  %v1086_v20 = vadd.f32 %v2605_v23, %v1000_v21  ;;  %p2047_p8 = pnand %p2046_p7, %p2042_p2 }
 0x24a   : > { %v1438_v60 = vadd.f32 %v2611_v30, %v1426_v57  ;;  %v1162_v59 = vpop.f32.mrf.mxu3  ;;  %v1249_v57 = vpop.f32.mrf.mxu1 }
 0x24b   : > { %v1172_v41 = vadd.f32 %v1162_v59, %v1086_v20 }
 0x24c   : > { %v1446_v35 = vmax.f32 %v1438_v60, 0.0 }
 0x24d   : > { %v1259_v60 = vadd.f32 %v1249_v57, %v1172_v41  ;;  %v2804_v57 = vld [vmem:[#allocation18_spill] sm:$0xff] }
 0x24e   : > { %1897 = vmatmul.msk.f32.gmra.mxu3 %vm490_vm0, %v1446_v35 }
 0x24f   : > { %v1409_v24 = vpop.f32.mrf.mxu2  ;;  %v1345_v11 = vadd.f32 %v1335_v5, %v1259_v60 }
 0x250   : > { %v1427_v63 = vadd.f32 %v1409_v24, %v1341_v18 }
 0x252   : > { %v1439_v1 = vadd.f32 %v2611_v30, %v1427_v63 }
 0x254   : > { %v1447_v31 = vmax.f32 %v1439_v1, 0.0 }
 0x256   : > { %1898 = vmatmul.msk.f32.gmra.mxu3 %vm490_vm0, %v1447_v31 }
 0x257   : > { %v1412_v6 = vpop.f32.mrf.mxu2 }
 0x258   : > { %v1428_v8 = vadd.f32 %v1412_v6, %v1342_v34  ;;  %v2797_v34 = vmax.f32 %v2306_v19, 0.0  ;;  %v1563_v19 = vld [vmem:[%s2764_s10] sm:$0xff] }
 0x259   : > { %1584 = vmatpush.msrb.mxu1 %v1563_v19 }
 0x25a   : > { %v1440_v32 = vadd.f32 %v2611_v30, %v1428_v8 }
 0x25c   : > { %v1448_v2 = vmax.f32 %v1440_v32, 0.0 }
 0x25e   : > { %1899 = vmatmul.msk.f32.gmra.mxu3 %vm490_vm0, %v1448_v2 }
 0x25f   : > { %v1415_v14 = vpop.f32.mrf.mxu2 }
 0x260   : > { %v1429_v28 = vadd.f32 %v1415_v14, %v1343_v13 }
 0x262   : > { %v1441_v51 = vadd.f32 %v2611_v30, %v1429_v28 }
 0x264   : > { %v1449_v56 = vmax.f32 %v1441_v51, 0.0 }
 0x266   : > { %1900 = vmatmul.msk.f32.gmra.mxu3 %vm490_vm0, %v1449_v56 }
 0x267   : > { %v1418_v7 = vpop.f32.mrf.mxu2 }
 0x268   : > { %v1430_v3 = vadd.f32 %v1418_v7, %v1344_v27  ;;  %v2805_v7 = vmax.f32 %v2804_v57, 0.0 }
 0x26a   : > { %v1442_v29 = vadd.f32 %v2611_v30, %v1430_v3 }
 0x26c   : > { %v1450_v35 = vmax.f32 %v1442_v29, 0.0 }
 0x26e   : > { %1901 = vmatmul.msk.f32.gmra.mxu3 %vm490_vm0, %v1450_v35 }
 0x26f   : > { %v1421_v23 = vpop.f32.mrf.mxu2 }
 0x270   : > { %v1431_v18 = vadd.f32 %v1421_v23, %v1345_v11 }
 0x272   : > { %v1443_v43 = vadd.f32 %v2611_v30, %v1431_v18 }
 0x274   : > { %v1451_v38 = vmax.f32 %v1443_v43, 0.0 }
 0x276   : > { %1902 = vmatmul.msk.f32.gmra.mxu3 %vm490_vm0, %v1451_v38 }
 0x2c1   : > { %v1501_v24 = vpop.f32.mrf.mxu3 }
 0x2c2   : > { %v1502_v1 = vadd.f32 %v1980_v45, %v1501_v24 }
 0x2c4   : > { %v1525_v48 = vadd.f32 %v1502_v1, %v2798_v4 }
 0x2c6   : > { %v1533_v16 = vmax.f32 %v1525_v48, 0.0 }
 0x2c8   : > { %v1541_v2 = vsel %vm570_vm1, %v1533_v16, 0.0 }
 0x2c9   : > { %v1504_v61 = vpop.f32.mrf.mxu3 }
 0x2ca   : > { %v1505_v37 = vadd.f32 %v1980_v45, %v1504_v61 }
 0x2cc   : > { %v1526_v17 = vadd.f32 %v1505_v37, %v2797_v34 }
 0x2ce   : > { %v1534_v10 = vmax.f32 %v1526_v17, 0.0 }
 0x2d0   : > { %v1542_v25 = vsel %vm570_vm1, %v1534_v10, 0.0 }
 0x2d1   : > { %v1507_v46 = vpop.f32.mrf.mxu3  ;;  %v1543_v21 = vadd.f32 %v1542_v25, %v1541_v2 }
 0x2d2   : > { %v1508_v47 = vadd.f32 %v1980_v45, %v1507_v46  ;;  %v1620_v46 = vpop.f32.mrf.mxu0 }
 0x2d4   : > { %v1527_v6 = vadd.f32 %v1508_v47, %v2799_v49 }
 0x2d6   : > { %v1535_v62 = vmax.f32 %v1527_v6, 0.0 }
 0x2d8   : > { %v1544_v13 = vsel %vm570_vm1, %v1535_v62, 0.0 }
 0x2d9   : > { %v1510_v63 = vpop.f32.mrf.mxu3  ;;  %v1545_v0 = vadd.f32 %v1544_v13, %v1543_v21 }
 0x2da   : > { %v1511_v30 = vadd.f32 %v1980_v45, %v1510_v63  ;;  %v1623_v63 = vmul.f32 0.015625, %v1620_v46 }
 0x2dc   : > { %v1528_v8 = vadd.f32 %v1511_v30, %v2800_v44 }
 0x2de   : > { %v1536_v52 = vmax.f32 %v1528_v8, 0.0 }
 0x2e0   : > { %v1546_v33 = vsel %vm570_vm1, %v1536_v52, 0.0 }
 0x2e1   : > { %v1513_v15 = vpop.f32.mrf.mxu3  ;;  %v1547_v12 = vadd.f32 %v1546_v33, %v1545_v0 }
 0x2e2   : > { %v1514_v50 = vadd.f32 %v1980_v45, %v1513_v15  ;;  %v1565_v15 = vld [vmem:[%s2766_s12] sm:$0x1] }
 0x2e4   : > { %v1529_v9 = vadd.f32 %v1514_v50, %v2801_v22 }
 0x2e6   : > { %v1537_v55 = vmax.f32 %v1529_v9, 0.0 }
 0x2e8   : > { %v1548_v20 = vsel %vm570_vm1, %v1537_v55, 0.0 }
 0x2e9   : > { %v1516_v31 = vpop.f32.mrf.mxu3  ;;  %v1549_v27 = vadd.f32 %v1548_v20, %v1547_v12 }
 0x2ea   : > { %v1517_v40 = vadd.f32 %v1980_v45, %v1516_v31 }
 0x2ec   : > { %v1530_v26 = vadd.f32 %v1517_v40, %v2802_v53 }
 0x2ee   : > { %v1538_v28 = vmax.f32 %v1530_v26, 0.0 }
 0x2f0   : > { %v1550_v56 = vsel %vm570_vm1, %v1538_v28, 0.0 }
 0x2f1   : > { %v1519_v32 = vpop.f32.mrf.mxu3  ;;  %v1551_v3 = vadd.f32 %v1550_v56, %v1549_v27 }
 0x2f2   : > { %v1520_v42 = vadd.f32 %v1980_v45, %v1519_v32 }
 0x2f4   : > { %v1531_v14 = vadd.f32 %v1520_v42, %v2803_v54 }
 0x2f6   : > { %v1539_v51 = vmax.f32 %v1531_v14, 0.0 }
 0x2f8   : > { %v1552_v41 = vsel %vm570_vm1, %v1539_v51, 0.0 }
 0x2f9   : > { %v1522_v36 = vpop.f32.mrf.mxu3  ;;  %v1553_v29 = vadd.f32 %v1552_v41, %v1551_v3 }
 0x2fa   : > { %v1523_v59 = vadd.f32 %v1980_v45, %v1522_v36 }
 0x2fc   : > { %v1532_v39 = vadd.f32 %v1523_v59, %v2805_v7 }
 0x2fe   : > { %v1540_v60 = vmax.f32 %v1532_v39, 0.0 }
 0x300   : > { %v1554_v5 = vsel %vm570_vm1, %v1540_v60, 0.0  ;;  %1906 = vmatpush.xpose.msk.msrb.mxu2 %vm570_vm1, %v1540_v60 }
 0x301   : > { %v1555_v35 = vadd.f32 %v1554_v5, %v1553_v29 }
 0x303   : > { %v1556_v11 = vrot.slane %v1555_v35, 4 }
 0x304   : > { %1907 = vmatpush.xpose.msk.msrb.mxu2 %vm570_vm1, %v1539_v51 }
 0x305   : > { %v1557_v23 = vadd.f32 %v1556_v11, %v1555_v35 }
 0x307   : > { %v1558_v18 = vrot.slane %v1557_v23, 2 }
 0x308   : > { %1908 = vmatpush.xpose.msk.msrb.mxu2 %vm570_vm1, %v1538_v28 }
 0x309   : > { %v1559_v43 = vadd.f32 %v1558_v18, %v1557_v23 }
 0x30b   : > { %v1560_v38 = vrot.slane %v1559_v43, 1 }
 0x30c   : > { %1909 = vmatpush.xpose.msk.msrb.mxu2 %vm570_vm1, %v1537_v55 }
 0x30d   : > { %v1561_v24 = vadd.f32 %v1560_v38, %v1559_v43 }
 0x30f   : > { %v1562_v61 = vmul.f32 0.015625, %v1561_v24 }
 0x310   : > { %1910 = vmatpush.xpose.msk.msrb.mxu2 %vm570_vm1, %v1536_v52 }
 0x311   : > { %1903 = vmatmul.msk.f32.vlgmr.msrb.gmra.mxu1 %vm570_vm1, %v1562_v61 }
 0x314   : > { %1911 = vmatpush.xpose.msk.msrb.mxu2 %vm570_vm1, %v1535_v62 }
 0x318   : > { %1912 = vmatpush.xpose.msk.msrb.mxu2 %vm570_vm1, %v1534_v10 }
 0x31c   : > { %1913 = vmatpush.xpose.msk.msrb.mxu2 %vm570_vm1, %v1533_v16 }
 0x31f   : > { %1914 = vmatmul.msk.f32.vlgmr.msrb.gmra.mxu2 %vm570_vm1, %v1623_v63 }
 0x38e   : > { %v1586_v45 = vpop.f32.mrf.mxu1 }
 0x38f   : > { %v1587_v37 = vadd.f32 %v1586_v45, %v1565_v15 }
 0x391   : > { %1590 = vst.msk [vmem:[%s462_s21] sm:$0x1] %vm1589_vm5, %v1587_v37 }
 0x392   : > { %2050 = shalt.err (!%p2047_p8)
}
 0x393   : > { %1922 = dma.vmem_to_hbm [thread:$0]  (%p2246_p5), %s1690_s23, 16, %s1692_s24, %s1675_s6   ;;  %vm1672_vm6 = vcmask 516096  }
 0x394   : > { %s1700_s29 = scalar_lea.hbm %s2768_s14, %s2229_s0  ;;  %s468_s15 = scalar_lea.vmem [#allocation9], %s2700_s28 }
 0x395   : > { %s1702_s2 = sshll.u32 %s468_s15, 4  ;;  %s1704_s3 = sshll.u32 %s1700_s29, 4  ;;  %s1703_s2 = int_to_ptr.vmem [resolvable:$true] %s1702_s2  ;;  %s1705_s3 = int_to_ptr.hbm [resolvable:$true] %s1704_s3 }
 0x396   : > { %s1679_s22 = scalar_lea.sflag [#allocation10], %s2700_s28  ;;  %s2065_s25 = sshra.s32 %s1705_s3, 4  ;;  %s2066_s25 = int_to_ptr.hbm [resolvable:$true] %s2065_s25 }
 0x397   : > { %s2067_s30 = scalar_lea.hbm %s2066_s25, 1  ;;  %s2071_s0 = scalar_lea.hbm %s2768_s14, 2 }
 0x398   : > { %p2068_p9 = scmp.ne.s32.totalorder %s2066_s25, %s2067_s30  ;;  %p2072_p12 = scmp.lt.s32.totalorder %s2066_s25, %s2768_s14 }
 0x399   : > { %p2073_p13 = scmp.lt.s32.totalorder %s2071_s0, %s2067_s30 }
 0x39a   : > { %p2069_p10 = pnand %p2068_p9, %p2246_p5 }
 0x39b   : > { %p2074_p0 = por %p2073_p13, %p2072_p12 }
 0x39c   : > { %p2070_p11 = pneg %p2069_p10 }
 0x39e   : > { %p2075_p1 = pnand %p2074_p0, %p2070_p11 }
 0x3a2   : > { %v1668_v1 = vpop.f32.mrf.mxu2 }
 0x3a3   : > { %v1671_v47 = vmax.f32 %v1668_v1, 0.0 }
 0x3a5   : > { %1673 = vst.msk [vmem:[%s468_s15] sm:$0x1] %vm1672_vm6, %v1671_v47 }
 0x3a6   : > { %2078 = shalt.err (!%p2075_p1)
}
 0x3a7   : > { %1923 = dma.vmem_to_hbm [thread:$0]  (%p2246_p5), %s1703_s2, 16, %s1705_s3, %s1679_s22  }
 0x3a8 PF: > { %p1939_p2 = scmp.ge.s32.totalorder %s2123_s20, 2  ;;  %s1716_s28 = sand.u32 1, %s2111_s17  }
 0x3a9   : > { %s1717_s16 = scalar_lea.sflag [#allocation7], %s1716_s28 }
 0x3aa   : > { %p1931_p3 = pnand %p1939_p2, %p2250_p6 }
 0x3ac   : > { %p1932_p4 = pneg %p1931_p3 }
 0x3ae   : > { %2102 = dma.done.wait (%p1932_p4), %s1717_s16, 16  }
 0x3af   : > { %2104 = vsyncadd (%p1932_p4), %s1717_s16, 4294967280  ;;  %s1726_s19 = scalar_lea.sflag [#allocation10], %s1716_s28 }
 0x3b0   : > { %2106 = dma.done.wait (%p1932_p4), %s1726_s19, 16  }
 0x3b1   : > { %2108 = vsyncadd (%p1932_p4), %s1726_s19, 4294967280  ;;  %s2806_s20 = sld [smem:[#allocation16_spill]]  ;;  %s2809_s17 = smov %s2115_s18 }
 0x3b2   : > { %s2807_s21 = sld [smem:[#allocation15_spill]] }
 0x3b3   : > { %s2808_s19 = sld [smem:[#allocation17_spill]] }
 0x3b7   : > { %p37_p5 = scmp.ge.s32.totalorder %s2806_s20, 4  }
 0x3b8   : > { %s2810_s18 = smov %s2807_s21 }
 0x3b9   :  { %39 = sbr.rel (!%p37_p5) target bundleno = 15 (0xf), region = 135 }
 0x3be   :  { %1731 = vsyncpa [#allocation6], 1 }
 0x3bf   :  { %1733 = vsyncpa [#allocation6 + $0x1], 1 }
 0x3c0   :  { %1734 = vsyncpa [#allocation7], 1 }
 0x3c1   :  { %1736 = vsyncpa [#allocation7 + $0x1], 1 }
 0x3c2   :  { %1737 = vsyncpa [#allocation10], 1 }
 0x3c3   :  { %1739 = vsyncpa [#allocation10 + $0x1], 1 }

</bundles_post_ra>
